<compile_context>
chip_gen: v5e
topology: v5e:2x2
jax: 0.10.0
libtpu: 0.0.40
codegen_flags: <defaults>
</compile_context>

<pallas_src>
import functools
import numpy as np

import jax
import jax.numpy as jnp
from jax import lax
from jax.experimental import pallas as pl
from jax.experimental.pallas import tpu as pltpu

F32 = jnp.float32
BF16 = jnp.bfloat16
LN_EPS = 1e-6
KSIZE = 7          # conv kernel size (padding = 3)
HALO = 3           # (KSIZE - 1) // 2
EDGE = 8           # 8-row edge slab used to fetch the halo from neighbouring tiles
_GELU_C = 0.7978845608028654  # sqrt(2/pi)

_CPARAMS = pltpu.CompilerParams(
    dimension_semantics=("parallel", "parallel"),
    vmem_limit_bytes=48 * 1024 * 1024,
)


# ----------------------------------------------------------------------------- small helpers
def _cdiv(a, b):
    return -(-a // b)


def _round_up(a, b):
    return _cdiv(a, b) * b


def _layer_norm(x, g, b):
    """PyTorch nn.LayerNorm over the last axis (biased variance, eps=1e-6), f32."""
    mu = jnp.mean(x, axis=-1, keepdims=True)
    var = jnp.mean((x - mu) ** 2, axis=-1, keepdims=True)
    return (x - mu) * lax.rsqrt(var + LN_EPS) * g + b


def _gelu_tanh(x):
    # tanh-approx GELU -> transcendental goes to the otherwise-idle EUP slot.
    # TODO(synk): PyTorch nn.GELU() default is exact erf-GELU; tanh form deviates by <~1e-3.
    return 0.5 * x * (1.0 + jnp.tanh(_GELU_C * (x + 0.044715 * (x * x * x))))


def _mask_tail(x, q, tile_t, t_total):
    """Zero rows whose global frame index >= t_total (keeps the zero-padding invariant)."""
    rows = lax.broadcasted_iota(jnp.int32, x.shape, 0)
    limit = t_total - q * tile_t
    return jnp.where(rows < limit, x, 0.0)


def _assemble_halo(prev_ref, cur_ref, nxt_ref, halo_ref, tile_t):
    """Build a (tile_t + 6, C) haloed window in VMEM scratch from cur + 3-row neighbours."""
    q = pl.program_id(1)
    n_q = pl.num_programs(1)
    c = halo_ref.shape[1]
    halo_ref[HALO:HALO + tile_t, :] = cur_ref[0]
    halo_ref[0:HALO, :] = prev_ref[0, EDGE - HALO:EDGE, :]
    halo_ref[HALO + tile_t:HALO + tile_t + HALO, :] = nxt_ref[0, 0:HALO, :]

    @pl.when(q == 0)
    def _():
        halo_ref[0:HALO, :] = jnp.zeros((HALO, c), F32)

    @pl.when(q == n_q - 1)
    def _():
        halo_ref[HALO + tile_t:HALO + tile_t + HALO, :] = jnp.zeros((HALO, c), F32)


# ----------------------------------------------------------------------------- kernels
def embed_kernel(prev_ref, cur_ref, nxt_ref, w_ref, b_ref, g_ref, beta_ref,
                 o_ref, halo_ref, *, t_total, tile_t):
    # Conv1d(n_mels, dim, 7, padding=3) as 7 shifted (tile_t, n_mels)@(n_mels, dim) matmuls
    # + backbone LayerNorm.  w_ref: (7, n_mels, dim) bf16.
    q = pl.program_id(1)
    _assemble_halo(prev_ref, cur_ref, nxt_ref, halo_ref, tile_t)
    acc = b_ref[...]                                    # (1, dim) -> broadcasts up
    for j in range(KSIZE):
        xj = halo_ref[j:j + tile_t, :].astype(BF16)
        acc = acc + jnp.dot(xj, w_ref[j], preferred_element_type=jnp.float32)
    y = _layer_norm(acc, g_ref[...], beta_ref[...])
    o_ref[0] = _mask_tail(y, q, tile_t, t_total)


def convnext_kernel(prev_ref, cur_ref, nxt_ref, dww_ref, dwb_ref, g_ref, b_ref,
                    w1_ref, b1_ref, w2_ref, b2_ref, gamma_ref, o_ref, halo_ref,
                    *, t_total, tile_t):
    # Depthwise conv(k=7) + LN + Linear + GELU + Linear + layer-scale + residual.
    q = pl.program_id(1)
    _assemble_halo(prev_ref, cur_ref, nxt_ref, halo_ref, tile_t)
    dww = dww_ref[...]                                  # (7, C) f32 depthwise taps
    y = dwb_ref[...]                                    # (1, C) bias
    for j in range(KSIZE):                              # depthwise conv, taps read from ref
        y = y + halo_ref[j:j + tile_t, :] * dww[j:j + 1, :]
    y = _layer_norm(y, g_ref[...], b_ref[...])
    h = jnp.dot(y.astype(BF16), w1_ref[...], preferred_element_type=jnp.float32) + b1_ref[...]
    h = _gelu_tanh(h)
    h = jnp.dot(h.astype(BF16), w2_ref[...], preferred_element_type=jnp.float32) + b2_ref[...]
    out = cur_ref[0] + gamma_ref[...] * h               # residual + layer-scale
    o_ref[0] = _mask_tail(out, q, tile_t, t_total)


def head_kernel(x_ref, g_ref, beta_ref, wm_ref, bm_ref, wp_ref, bp_ref,
                cosb_ref, sinb_ref, o_ref, *, t_total, tile_t):
    # final LN + lane-dense Linear(dim -> NF mag, NF phase) + exp/clip/cos/sin +
    # windowed inverse-rDFT frame synthesis (two matmuls against the padded bases).
    q = pl.program_id(1)
    x = _layer_norm(x_ref[0], g_ref[...], beta_ref[...])
    xb = x.astype(BF16)
    sm = jnp.dot(xb, wm_ref[...], preferred_element_type=jnp.float32) + bm_ref[...]
    sp = jnp.dot(xb, wp_ref[...], preferred_element_type=jnp.float32) + bp_ref[...]
    mag = jnp.minimum(jnp.exp(sm), 100.0)               # exp then clip(max=100)
    real = (mag * jnp.cos(sp)).astype(BF16)
    imag = (mag * jnp.sin(sp)).astype(BF16)
    frames = (jnp.dot(real, cosb_ref[...], preferred_element_type=jnp.float32)
              + jnp.dot(imag, sinb_ref[...], preferred_element_type=jnp.float32))
    o_ref[0] = _mask_tail(frames, q, tile_t, t_total)


# ----------------------------------------------------------------------------- pallas wrappers
def _w_spec(shape):
    nd = len(shape)
    return pl.BlockSpec(tuple(shape), lambda b, q: (0,) * nd)


def _halo_specs(tile_t, channels, t_round):
    """(prev-edge, cur, next-edge) specs over the same (B, t_round, channels) array."""
    spb = tile_t // EDGE           # edge-slabs per time tile
    n_slabs = t_round // EDGE
    prev = pl.BlockSpec((1, EDGE, channels),
                        lambda b, q: (b, jnp.maximum(q * spb - 1, 0), 0))
    cur = pl.BlockSpec((1, tile_t, channels), lambda b, q: (b, q, 0))
    nxt = pl.BlockSpec((1, EDGE, channels),
                       lambda b, q: (b, jnp.minimum((q + 1) * spb, n_slabs - 1), 0))
    return prev, cur, nxt


def embed_call(mel_cl, w, b, g, beta, *, t_total, tile_t):
    B, t_round, n_mels = mel_cl.shape
    n_tiles = t_round // tile_t
    dim = w.shape[2]
    prev, cur, nxt = _halo_specs(tile_t, n_mels, t_round)
    kern = functools.partial(embed_kernel, t_total=t_total, tile_t=tile_t)
    return pl.pallas_call(
        kern,
        out_shape=jax.ShapeDtypeStruct((B, t_round, dim), F32),
        grid=(B, n_tiles),
        in_specs=[prev, cur, nxt, _w_spec(w.shape), _w_spec(b.shape),
                  _w_spec(g.shape), _w_spec(beta.shape)],
        out_specs=pl.BlockSpec((1, tile_t, dim), lambda b_, q: (b_, q, 0)),
        scratch_shapes=[pltpu.VMEM((tile_t + 2 * EDGE, n_mels), F32)],
        compiler_params=_CPARAMS,
    )(mel_cl, mel_cl, mel_cl, w, b, g, beta)


def convnext_call(x, blk, *, t_total, tile_t):
    B, t_round, dim = x.shape
    n_tiles = t_round // tile_t
    prev, cur, nxt = _halo_specs(tile_t, dim, t_round)
    kern = functools.partial(convnext_kernel, t_total=t_total, tile_t=tile_t)
    wargs = (blk["dww"], blk["dwb"], blk["g"], blk["b"],
             blk["w1"], blk["b1"], blk["w2"], blk["b2"], blk["gamma"])
    return pl.pallas_call(
        kern,
        out_shape=jax.ShapeDtypeStruct((B, t_round, dim), F32),
        grid=(B, n_tiles),
        in_specs=[prev, cur, nxt] + [_w_spec(a.shape) for a in wargs],
        out_specs=pl.BlockSpec((1, tile_t, dim), lambda b_, q: (b_, q, 0)),
        scratch_shapes=[pltpu.VMEM((tile_t + 2 * EDGE, dim), F32)],
        compiler_params=_CPARAMS,
    )(x, x, x, *wargs)


def head_call(x, params, *, t_total, tile_t, n_fft):
    B, t_round, dim = x.shape
    n_tiles = t_round // tile_t
    kern = functools.partial(head_kernel, t_total=t_total, tile_t=tile_t)
    wargs = (params["final_g"], params["final_b"],
             params["out_wm"], params["out_bm"], params["out_wp"], params["out_bp"],
             params["cosb"], params["sinb"])
    return pl.pallas_call(
        kern,
        out_shape=jax.ShapeDtypeStruct((B, t_round, n_fft), F32),
        grid=(B, n_tiles),
        in_specs=[pl.BlockSpec((1, tile_t, dim), lambda b_, q: (b_, q, 0))]
                 + [_w_spec(a.shape) for a in wargs],
        out_specs=pl.BlockSpec((1, tile_t, n_fft), lambda b_, q: (b_, q, 0)),
        compiler_params=_CPARAMS,
    )(x, *wargs)


# ----------------------------------------------------------------------------- iSTFT glue
def build_istft_basis(n_fft, nf_pad):
    """Windowed inverse-rDFT basis (frame = real @ cosb + imag @ sinb == window * irfft),
    zero-padded along the frequency axis to nf_pad rows, stored bf16."""
    N = n_fft
    nf = N // 2 + 1
    n = np.arange(N)
    k = np.arange(nf)
    window = 0.5 - 0.5 * np.cos(2.0 * np.pi * n / N)      # torch.hann_window (periodic)
    coef = np.full((nf,), 2.0 / N)
    coef[0] = 1.0 / N
    if N % 2 == 0:
        coef[-1] = 1.0 / N
    ang = 2.0 * np.pi * np.outer(k, n) / N
    cosb = (coef[:, None] * np.cos(ang)) * window[None, :]
    sinb = (-coef[:, None] * np.sin(ang)) * window[None, :]
    cosb = np.pad(cosb, ((0, nf_pad - nf), (0, 0)))
    sinb = np.pad(sinb, ((0, nf_pad - nf), (0, 0)))
    return jnp.asarray(cosb, BF16), jnp.asarray(sinb, BF16)


def _inv_envelope(t_valid, n_fft, hop):
    """1 / (window^2 overlap-add envelope), trimmed by n_fft//2 on each side (constant)."""
    n = np.arange(n_fft)
    w2 = (0.5 - 0.5 * np.cos(2.0 * np.pi * n / n_fft)) ** 2
    total = n_fft + (t_valid - 1) * hop
    env = np.zeros((total,), np.float64)
    for t in range(t_valid):
        env[t * hop:t * hop + n_fft] += w2
    start = n_fft // 2
    length = (t_valid - 1) * hop
    # TODO(synk): torch.istft asserts a nonzero envelope; we clamp at 1e-8 like before.
    return jnp.asarray(1.0 / np.maximum(env[start:start + length], 1e-8), F32)


def _overlap_add(frames, t_valid, n_fft, hop):
    """Dense shifted-add overlap-add (no scatter).  frames: (B, t_frames, n_fft) with
    rows >= t_valid already zero; returns (B, (t_valid-1)*hop)."""
    assert n_fft % hop == 0
    B, t_frames, _ = frames.shape
    r = n_fft // hop
    fr = frames.reshape(B, t_frames, r, hop)
    ola = None
    for c in range(r):
        part = jnp.pad(fr[:, :, c, :], ((0, 0), (c, r - 1 - c), (0, 0)))
        ola = part if ola is None else ola + part
    ola = ola.reshape(B, (t_frames + r - 1) * hop)
    start = n_fft // 2
    length = (t_valid - 1) * hop
    return ola[:, start:start + length] * _inv_envelope(t_valid, n_fft, hop)


# ----------------------------------------------------------------------------- params
def init_params(key, *, n_mels, dim, inter, n_layers, n_fft):
    n_freq = n_fft // 2 + 1
    nf_pad = _round_up(n_freq, 128)
    keys = iter(jax.random.split(key, 8 + 8 * n_layers))

    def nrm(shape, scale=0.05):
        return scale * jax.random.normal(next(keys), shape, dtype=F32)

    # NOTE: a real export must permute the torch Conv1d weight (out, in, k) -> (k, in, out)
    # and the Linear weights (out, in) -> (in, out); random weights here.
    params = {
        "embed_w": nrm((KSIZE, n_mels, dim)).astype(BF16),
        "embed_b": nrm((1, dim)),
        "norm_g": jnp.ones((1, dim), F32),
        "norm_b": jnp.zeros((1, dim), F32),
        "final_g": jnp.ones((1, dim), F32),
        "final_b": jnp.zeros((1, dim), F32),
        "blocks": [],
    }
    # ISTFTHead.out = Linear(dim, n_fft + 2): cols [0, n_freq) -> log-magnitude,
    # cols [n_freq, 2*n_freq) -> phase.  Split + zero-pad to a 128-lane boundary.
    wm = jnp.pad(nrm((dim, n_freq)), ((0, 0), (0, nf_pad - n_freq)))
    wp = jnp.pad(nrm((dim, n_freq)), ((0, 0), (0, nf_pad - n_freq)))
    params["out_wm"] = wm.astype(BF16)
    params["out_wp"] = wp.astype(BF16)
    params["out_bm"] = jnp.pad(nrm((1, n_freq)), ((0, 0), (0, nf_pad - n_freq)))
    params["out_bp"] = jnp.pad(nrm((1, n_freq)), ((0, 0), (0, nf_pad - n_freq)))
    for _ in range(n_layers):
        params["blocks"].append({
            "dww": nrm((KSIZE, dim)),                       # depthwise Conv1d taps (f32)
            "dwb": nrm((1, dim)),
            "g": jnp.ones((1, dim), F32),
            "b": jnp.zeros((1, dim), F32),
            "w1": nrm((dim, inter)).astype(BF16),           # pwconv1
            "b1": nrm((1, inter)),
            "w2": nrm((inter, dim)).astype(BF16),           # pwconv2
            "b2": nrm((1, dim)),
            "gamma": jnp.full((1, dim), 1.0 / n_layers, F32),
        })
    cosb, sinb = build_istft_basis(n_fft, nf_pad)
    params["cosb"], params["sinb"] = cosb, sinb
    return params


# ----------------------------------------------------------------------------- forward
def vocos_vocoder_forward(mel, params, *, n_fft, hop, tile_t=256):
    """mel: (B, n_mels, T) float32 (PyTorch NCW) -> audio (B, (T-1)*hop)."""
    B, n_mels, T = mel.shape
    tt = _round_up(min(tile_t, T), EDGE)
    n_tiles = _cdiv(T, tt)
    t_round = n_tiles * tt

    x = jnp.transpose(mel, (0, 2, 1))                       # (B, T, n_mels)
    x = jnp.pad(x, ((0, 0), (0, t_round - T), (0, 0)))      # zero tail rows keep the
                                                            # zero-padding invariant
    # backbone.embed (Conv1d k=7 pad=3) + backbone.norm
    x = embed_call(x, params["embed_w"], params["embed_b"],
                   params["norm_g"], params["norm_b"], t_total=T, tile_t=tt)
    # ConvNeXt blocks (whole block fused per (batch, time-tile) grid step)
    for blk in params["blocks"]:
        x = convnext_call(x, blk, t_total=T, tile_t=tt)
    # ISTFTHead: final LN + Linear + exp/clip + cos/sin + iSTFT frame synthesis
    frames = head_call(x, params, t_total=T, tile_t=tt, n_fft=n_fft)   # (B, t_round, n_fft)
    return _overlap_add(frames, T, n_fft, hop)


# ----------------------------------------------------------------------------- pure-JAX reference
def reference_forward(mel, params, *, n_fft, hop):
    B, n_mels, T = mel.shape
    dim = params["embed_b"].shape[1]
    x = jnp.transpose(mel, (0, 2, 1))
    # embed conv k=7 pad=3 + LN
    xp = jnp.pad(x, ((0, 0), (HALO, HALO), (0, 0))).astype(BF16)
    y = jnp.zeros((B, T, dim), F32) + params["embed_b"]
    for j in range(KSIZE):
        y = y + jnp.einsum("btm,md->btd", xp[:, j:j + T, :], params["embed_w"][j],
                           preferred_element_type=jnp.float32)
    x = _layer_norm(y, params["norm_g"], params["norm_b"])
    # ConvNeXt blocks
    for blk in params["blocks"]:
        res = x
        xpad = jnp.pad(x, ((0, 0), (HALO, HALO), (0, 0)))
        h = jnp.zeros_like(x) + blk["dwb"]
        for j in range(KSIZE):
            h = h + xpad[:, j:j + T, :] * blk["dww"][j][None, None, :]
        h = _layer_norm(h, blk["g"], blk["b"])
        h = jnp.einsum("btc,cf->btf", h.astype(BF16), blk["w1"],
                       preferred_element_type=jnp.float32) + blk["b1"]
        h = _gelu_tanh(h)
        h = jnp.einsum("btf,fc->btc", h.astype(BF16), blk["w2"],
                       preferred_element_type=jnp.float32) + blk["b2"]
        x = res + blk["gamma"] * h
    # head
    x = _layer_norm(x, params["final_g"], params["final_b"])
    xb = x.astype(BF16)
    sm = jnp.einsum("btc,cf->btf", xb, params["out_wm"],
                    preferred_element_type=jnp.float32) + params["out_bm"]
    sp = jnp.einsum("btc,cf->btf", xb, params["out_wp"],
                    preferred_element_type=jnp.float32) + params["out_bp"]
    mag = jnp.minimum(jnp.exp(sm), 100.0)
    real = (mag * jnp.cos(sp)).astype(BF16)
    imag = (mag * jnp.sin(sp)).astype(BF16)
    frames = (jnp.einsum("btf,fn->btn", real, params["cosb"],
                         preferred_element_type=jnp.float32)
              + jnp.einsum("btf,fn->btn", imag, params["sinb"],
                           preferred_element_type=jnp.float32))
    return _overlap_add(frames, T, n_fft, hop)


# ----------------------------------------------------------------------------- main
if __name__ == "__main__":
    B, n_mels, T = 2, 16, 20          # small synthetic config
    dim, inter, n_layers = 64, 128, 2
    n_fft, hop = 16, 4

    key = jax.random.PRNGKey(0)
    kp, kx = jax.random.split(key)
    params = init_params(kp, n_mels=n_mels, dim=dim, inter=inter,
                         n_layers=n_layers, n_fft=n_fft)
    mel = jax.random.normal(kx, (B, n_mels, T), dtype=F32)

    fwd = jax.jit(functools.partial(vocos_vocoder_forward,
                                    n_fft=n_fft, hop=hop, tile_t=8))  # 3 time tiles
    audio = jax.block_until_ready(fwd(mel, params))

    assert audio.shape == (B, (T - 1) * hop), audio.shape
    assert bool(jnp.all(jnp.isfinite(audio)))

    # numerical check of the Pallas path (tiled, haloed, bf16-MXU) vs a plain JAX reference
    ref = jax.block_until_ready(reference_forward(mel, params, n_fft=n_fft, hop=hop))
    np.testing.assert_allclose(np.asarray(audio), np.asarray(ref), rtol=2e-2, atol=2e-2)

    print("KERNEL_OK")
</pallas_src>

<mosaic_0001>
module attributes {stable_mosaic.version = 11 : i64} {
  func.func @convnext_kernel(%arg0: i32, %arg1: i32, %arg2: memref<1x8x64xf32, #tpu.memory_space<vmem>>, %arg3: memref<1x8x64xf32, #tpu.memory_space<vmem>>, %arg4: memref<1x8x64xf32, #tpu.memory_space<vmem>>, %arg5: memref<7x64xf32, #tpu.memory_space<vmem>>, %arg6: memref<1x64xf32, #tpu.memory_space<vmem>>, %arg7: memref<1x64xf32, #tpu.memory_space<vmem>>, %arg8: memref<1x64xf32, #tpu.memory_space<vmem>>, %arg9: memref<64x128xbf16, #tpu.memory_space<vmem>>, %arg10: memref<1x128xf32, #tpu.memory_space<vmem>>, %arg11: memref<128x64xbf16, #tpu.memory_space<vmem>>, %arg12: memref<1x64xf32, #tpu.memory_space<vmem>>, %arg13: memref<1x64xf32, #tpu.memory_space<vmem>>, %arg14: memref<1x8x64xf32, #tpu.memory_space<vmem>>, %arg15: memref<24x64xf32, #tpu.memory_space<vmem>>) attributes {dimension_semantics = [#tpu.dimension_semantics<parallel>, #tpu.dimension_semantics<parallel>], iteration_bounds = array<i64: 2, 3>, scalar_prefetch = 0 : i64, scratch_operands = 1 : i64, tpu.core_type = #tpu.core_type<tc>, window_params = [{transform_indices = @transform_0, window_bounds = array<i64: 1, 8, 64>}, {transform_indices = @transform_1, window_bounds = array<i64: 1, 8, 64>}, {transform_indices = @transform_2, window_bounds = array<i64: 1, 8, 64>}, {pipeline_mode = #tpu.pipeline_mode<synchronous>, transform_indices = @transform_3, window_bounds = array<i64: 7, 64>}, {pipeline_mode = #tpu.pipeline_mode<synchronous>, transform_indices = @transform_4, window_bounds = array<i64: 1, 64>}, {pipeline_mode = #tpu.pipeline_mode<synchronous>, transform_indices = @transform_5, window_bounds = array<i64: 1, 64>}, {pipeline_mode = #tpu.pipeline_mode<synchronous>, transform_indices = @transform_6, window_bounds = array<i64: 1, 64>}, {pipeline_mode = #tpu.pipeline_mode<synchronous>, transform_indices = @transform_7, window_bounds = array<i64: 64, 128>}, {pipeline_mode = #tpu.pipeline_mode<synchronous>, transform_indices = @transform_8, window_bounds = array<i64: 1, 128>}, {pipeline_mode = #tpu.pipeline_mode<synchronous>, transform_indices = @transform_9, window_bounds = array<i64: 128, 64>}, {pipeline_mode = #tpu.pipeline_mode<synchronous>, transform_indices = @transform_10, window_bounds = array<i64: 1, 64>}, {pipeline_mode = #tpu.pipeline_mode<synchronous>, transform_indices = @transform_11, window_bounds = array<i64: 1, 64>}, {transform_indices = @transform_12, window_bounds = array<i64: 1, 8, 64>}]} {
    %c0 = arith.constant 0 : index
    %c0_0 = arith.constant 0 : index
    %c0_1 = arith.constant 0 : index
    %0 = vector.load %arg3[%c0, %c0_0, %c0_1] : memref<1x8x64xf32, #tpu.memory_space<vmem>>, vector<1x8x64xf32>
    %1 = vector.shape_cast %0 : vector<1x8x64xf32> to vector<8x64xf32>
    %c3 = arith.constant 3 : index
    %c0_2 = arith.constant 0 : index
    %2 = vector.load %arg15[%c3, %c0_2] : memref<24x64xf32, #tpu.memory_space<vmem>>, vector<8x64xf32>
    tpu.vector_store %arg15[%c3, %c0_2], %1 {strides = array<i32>} : memref<24x64xf32, #tpu.memory_space<vmem>>, vector<8x64xf32>,
    %c0_3 = arith.constant 0 : index
    %c5 = arith.constant 5 : index
    %c0_4 = arith.constant 0 : index
    %3 = vector.load %arg2[%c0_3, %c5, %c0_4] : memref<1x8x64xf32, #tpu.memory_space<vmem>>, vector<1x3x64xf32>
    %4 = vector.shape_cast %3 : vector<1x3x64xf32> to vector<3x64xf32>
    %c0_5 = arith.constant 0 : index
    %c0_6 = arith.constant 0 : index
    %5 = vector.load %arg15[%c0_5, %c0_6] : memref<24x64xf32, #tpu.memory_space<vmem>>, vector<3x64xf32>
    tpu.vector_store %arg15[%c0_5, %c0_6], %4 {strides = array<i32>} : memref<24x64xf32, #tpu.memory_space<vmem>>, vector<3x64xf32>,
    %c0_7 = arith.constant 0 : index
    %c0_8 = arith.constant 0 : index
    %c0_9 = arith.constant 0 : index
    %6 = vector.load %arg4[%c0_7, %c0_8, %c0_9] : memref<1x8x64xf32, #tpu.memory_space<vmem>>, vector<1x3x64xf32>
    %7 = vector.shape_cast %6 : vector<1x3x64xf32> to vector<3x64xf32>
    %c11 = arith.constant 11 : index
    %c0_10 = arith.constant 0 : index
    %8 = vector.load %arg15[%c11, %c0_10] : memref<24x64xf32, #tpu.memory_space<vmem>>, vector<3x64xf32>
    tpu.vector_store %arg15[%c11, %c0_10], %7 {strides = array<i32>} : memref<24x64xf32, #tpu.memory_space<vmem>>, vector<3x64xf32>,
    %c0_i32 = arith.constant 0 : i32
    %9 = arith.cmpi eq, %arg1, %c0_i32 : i32
    %10 = arith.extui %9 : i1 to i32
    %c0_i32_11 = arith.constant 0 : i32
    %11 = arith.cmpi ne, %10, %c0_i32_11 : i32
    scf.if %11 {
      %cst_58 = arith.constant 0.000000e+00 : f32
      %118 = vector.broadcast %cst_58 : f32 to vector<3x64xf32>
      %c0_59 = arith.constant 0 : index
      %c0_60 = arith.constant 0 : index
      %119 = vector.load %arg15[%c0_59, %c0_60] : memref<24x64xf32, #tpu.memory_space<vmem>>, vector<3x64xf32>
      tpu.vector_store %arg15[%c0_59, %c0_60], %118 {strides = array<i32>} : memref<24x64xf32, #tpu.memory_space<vmem>>, vector<3x64xf32>,
    } else {
    }
    %c2_i32 = arith.constant 2 : i32
    %12 = arith.cmpi eq, %arg1, %c2_i32 : i32
    %13 = arith.extui %12 : i1 to i32
    %c0_i32_12 = arith.constant 0 : i32
    %14 = arith.cmpi ne, %13, %c0_i32_12 : i32
    scf.if %14 {
      %cst_58 = arith.constant 0.000000e+00 : f32
      %118 = vector.broadcast %cst_58 : f32 to vector<3x64xf32>
      %c11_59 = arith.constant 11 : index
      %c0_60 = arith.constant 0 : index
      %119 = vector.load %arg15[%c11_59, %c0_60] : memref<24x64xf32, #tpu.memory_space<vmem>>, vector<3x64xf32>
      tpu.vector_store %arg15[%c11_59, %c0_60], %118 {strides = array<i32>} : memref<24x64xf32, #tpu.memory_space<vmem>>, vector<3x64xf32>,
    } else {
    }
    %c0_13 = arith.constant 0 : index
    %c0_14 = arith.constant 0 : index
    %15 = vector.load %arg5[%c0_13, %c0_14] : memref<7x64xf32, #tpu.memory_space<vmem>>, vector<7x64xf32>
    %c0_15 = arith.constant 0 : index
    %c0_16 = arith.constant 0 : index
    %16 = vector.load %arg6[%c0_15, %c0_16] : memref<1x64xf32, #tpu.memory_space<vmem>>, vector<1x64xf32>
    %c0_17 = arith.constant 0 : index
    %c0_18 = arith.constant 0 : index
    %17 = vector.load %arg15[%c0_17, %c0_18] : memref<24x64xf32, #tpu.memory_space<vmem>>, vector<8x64xf32>
    %18 = vector.extract_strided_slice %15 {offsets = [0, 0], sizes = [1, 64], strides = [1, 1]} : vector<7x64xf32> to vector<1x64xf32>
    %19 = vector.broadcast %18 : vector<1x64xf32> to vector<8x64xf32>
    %20 = arith.mulf %17, %19 : vector<8x64xf32>
    %21 = vector.broadcast %16 : vector<1x64xf32> to vector<8x64xf32>
    %22 = arith.addf %21, %20 : vector<8x64xf32>
    %c1 = arith.constant 1 : index
    %c0_19 = arith.constant 0 : index
    %23 = vector.load %arg15[%c1, %c0_19] : memref<24x64xf32, #tpu.memory_space<vmem>>, vector<8x64xf32>
    %24 = vector.extract_strided_slice %15 {offsets = [1, 0], sizes = [1, 64], strides = [1, 1]} : vector<7x64xf32> to vector<1x64xf32>
    %25 = vector.broadcast %24 : vector<1x64xf32> to vector<8x64xf32>
    %26 = arith.mulf %23, %25 : vector<8x64xf32>
    %27 = arith.addf %22, %26 : vector<8x64xf32>
    %c2 = arith.constant 2 : index
    %c0_20 = arith.constant 0 : index
    %28 = vector.load %arg15[%c2, %c0_20] : memref<24x64xf32, #tpu.memory_space<vmem>>, vector<8x64xf32>
    %29 = vector.extract_strided_slice %15 {offsets = [2, 0], sizes = [1, 64], strides = [1, 1]} : vector<7x64xf32> to vector<1x64xf32>
    %30 = vector.broadcast %29 : vector<1x64xf32> to vector<8x64xf32>
    %31 = arith.mulf %28, %30 : vector<8x64xf32>
    %32 = arith.addf %27, %31 : vector<8x64xf32>
    %c3_21 = arith.constant 3 : index
    %c0_22 = arith.constant 0 : index
    %33 = vector.load %arg15[%c3_21, %c0_22] : memref<24x64xf32, #tpu.memory_space<vmem>>, vector<8x64xf32>
    %34 = vector.extract_strided_slice %15 {offsets = [3, 0], sizes = [1, 64], strides = [1, 1]} : vector<7x64xf32> to vector<1x64xf32>
    %35 = vector.broadcast %34 : vector<1x64xf32> to vector<8x64xf32>
    %36 = arith.mulf %33, %35 : vector<8x64xf32>
    %37 = arith.addf %32, %36 : vector<8x64xf32>
    %c4 = arith.constant 4 : index
    %c0_23 = arith.constant 0 : index
    %38 = vector.load %arg15[%c4, %c0_23] : memref<24x64xf32, #tpu.memory_space<vmem>>, vector<8x64xf32>
    %39 = vector.extract_strided_slice %15 {offsets = [4, 0], sizes = [1, 64], strides = [1, 1]} : vector<7x64xf32> to vector<1x64xf32>
    %40 = vector.broadcast %39 : vector<1x64xf32> to vector<8x64xf32>
    %41 = arith.mulf %38, %40 : vector<8x64xf32>
    %42 = arith.addf %37, %41 : vector<8x64xf32>
    %c5_24 = arith.constant 5 : index
    %c0_25 = arith.constant 0 : index
    %43 = vector.load %arg15[%c5_24, %c0_25] : memref<24x64xf32, #tpu.memory_space<vmem>>, vector<8x64xf32>
    %44 = vector.extract_strided_slice %15 {offsets = [5, 0], sizes = [1, 64], strides = [1, 1]} : vector<7x64xf32> to vector<1x64xf32>
    %45 = vector.broadcast %44 : vector<1x64xf32> to vector<8x64xf32>
    %46 = arith.mulf %43, %45 : vector<8x64xf32>
    %47 = arith.addf %42, %46 : vector<8x64xf32>
    %c6 = arith.constant 6 : index
    %c0_26 = arith.constant 0 : index
    %48 = vector.load %arg15[%c6, %c0_26] : memref<24x64xf32, #tpu.memory_space<vmem>>, vector<8x64xf32>
    %49 = vector.extract_strided_slice %15 {offsets = [6, 0], sizes = [1, 64], strides = [1, 1]} : vector<7x64xf32> to vector<1x64xf32>
    %50 = vector.broadcast %49 : vector<1x64xf32> to vector<8x64xf32>
    %51 = arith.mulf %48, %50 : vector<8x64xf32>
    %52 = arith.addf %47, %51 : vector<8x64xf32>
    %c0_27 = arith.constant 0 : index
    %c0_28 = arith.constant 0 : index
    %53 = vector.load %arg7[%c0_27, %c0_28] : memref<1x64xf32, #tpu.memory_space<vmem>>, vector<1x64xf32>
    %c0_29 = arith.constant 0 : index
    %c0_30 = arith.constant 0 : index
    %54 = vector.load %arg8[%c0_29, %c0_30] : memref<1x64xf32, #tpu.memory_space<vmem>>, vector<1x64xf32>
    %cst = arith.constant dense<0.000000e+00> : vector<8xf32>
    %55 = vector.multi_reduction <add>, %52, %cst [1] : vector<8x64xf32> to vector<8xf32>
    %56 = vector.shape_cast %55 : vector<8xf32> to vector<8x1xf32>
    %cst_31 = arith.constant 6.400000e+01 : f32
    %57 = vector.broadcast %cst_31 : f32 to vector<8x1xf32>
    %58 = arith.divf %56, %57 : vector<8x1xf32>
    %59 = vector.broadcast %58 : vector<8x1xf32> to vector<8x64xf32>
    %60 = arith.subf %52, %59 : vector<8x64xf32>
    %61 = arith.mulf %60, %60 : vector<8x64xf32>
    %cst_32 = arith.constant dense<0.000000e+00> : vector<8xf32>
    %62 = vector.multi_reduction <add>, %61, %cst_32 [1] : vector<8x64xf32> to vector<8xf32>
    %63 = vector.shape_cast %62 : vector<8xf32> to vector<8x1xf32>
    %cst_33 = arith.constant 6.400000e+01 : f32
    %64 = vector.broadcast %cst_33 : f32 to vector<8x1xf32>
    %65 = arith.divf %63, %64 : vector<8x1xf32>
    %66 = vector.broadcast %58 : vector<8x1xf32> to vector<8x64xf32>
    %67 = arith.subf %52, %66 : vector<8x64xf32>
    %cst_34 = arith.constant 9.99999997E-7 : f32
    %68 = vector.broadcast %cst_34 : f32 to vector<8x1xf32>
    %69 = arith.addf %65, %68 : vector<8x1xf32>
    %70 = math.rsqrt %69 : vector<8x1xf32>
    %71 = vector.broadcast %70 : vector<8x1xf32> to vector<8x64xf32>
    %72 = arith.mulf %67, %71 : vector<8x64xf32>
    %73 = vector.broadcast %53 : vector<1x64xf32> to vector<8x64xf32>
    %74 = arith.mulf %72, %73 : vector<8x64xf32>
    %75 = vector.broadcast %54 : vector<1x64xf32> to vector<8x64xf32>
    %76 = arith.addf %74, %75 : vector<8x64xf32>
    %77 = arith.truncf %76 : vector<8x64xf32> to vector<8x64xbf16>
    %c0_35 = arith.constant 0 : index
    %c0_36 = arith.constant 0 : index
    %78 = vector.load %arg9[%c0_35, %c0_36] : memref<64x128xbf16, #tpu.memory_space<vmem>>, vector<64x128xbf16>
    %cst_37 = arith.constant dense<0.000000e+00> : vector<8x128xf32>
    %79 = tpu.matmul %77, %78, %cst_37 {dimension_numbers = #tpu.dot_dimension_numbers<[1], [0], [0], [1], [0, 0, 1, 1], [], []>} : vector<8x64xbf16>, vector<64x128xbf16>, vector<8x128xf32> -> vector<8x128xf32>
    %c0_38 = arith.constant 0 : index
    %c0_39 = arith.constant 0 : index
    %80 = vector.load %arg10[%c0_38, %c0_39] : memref<1x128xf32, #tpu.memory_space<vmem>>, vector<1x128xf32>
    %81 = vector.broadcast %80 : vector<1x128xf32> to vector<8x128xf32>
    %82 = arith.addf %79, %81 : vector<8x128xf32>
    %cst_40 = arith.constant 5.000000e-01 : f32
    %83 = vector.broadcast %cst_40 : f32 to vector<8x128xf32>
    %84 = arith.mulf %83, %82 : vector<8x128xf32>
    %85 = arith.mulf %82, %82 : vector<8x128xf32>
    %86 = arith.mulf %85, %82 : vector<8x128xf32>
    %cst_41 = arith.constant 4.471500e-02 : f32
    %87 = vector.broadcast %cst_41 : f32 to vector<8x128xf32>
    %88 = arith.mulf %87, %86 : vector<8x128xf32>
    %89 = arith.addf %82, %88 : vector<8x128xf32>
    %cst_42 = arith.constant 0.797884583 : f32
    %90 = vector.broadcast %cst_42 : f32 to vector<8x128xf32>
    %91 = arith.mulf %90, %89 : vector<8x128xf32>
    %92 = math.tanh %91 : vector<8x128xf32>
    %cst_43 = arith.constant 1.000000e+00 : f32
    %93 = vector.broadcast %cst_43 : f32 to vector<8x128xf32>
    %94 = arith.addf %93, %92 : vector<8x128xf32>
    %95 = arith.mulf %84, %94 : vector<8x128xf32>
    %96 = arith.truncf %95 : vector<8x128xf32> to vector<8x128xbf16>
    %c0_44 = arith.constant 0 : index
    %c0_45 = arith.constant 0 : index
    %97 = vector.load %arg11[%c0_44, %c0_45] : memref<128x64xbf16, #tpu.memory_space<vmem>>, vector<128x64xbf16>
    %cst_46 = arith.constant dense<0.000000e+00> : vector<8x64xf32>
    %98 = tpu.matmul %96, %97, %cst_46 {dimension_numbers = #tpu.dot_dimension_numbers<[1], [0], [0], [1], [0, 0, 1, 1], [], []>} : vector<8x128xbf16>, vector<128x64xbf16>, vector<8x64xf32> -> vector<8x64xf32>
    %c0_47 = arith.constant 0 : index
    %c0_48 = arith.constant 0 : index
    %99 = vector.load %arg12[%c0_47, %c0_48] : memref<1x64xf32, #tpu.memory_space<vmem>>, vector<1x64xf32>
    %100 = vector.broadcast %99 : vector<1x64xf32> to vector<8x64xf32>
    %101 = arith.addf %98, %100 : vector<8x64xf32>
    %c0_49 = arith.constant 0 : index
    %c0_50 = arith.constant 0 : index
    %c0_51 = arith.constant 0 : index
    %102 = vector.load %arg3[%c0_49, %c0_50, %c0_51] : memref<1x8x64xf32, #tpu.memory_space<vmem>>, vector<1x8x64xf32>
    %103 = vector.shape_cast %102 : vector<1x8x64xf32> to vector<8x64xf32>
    %c0_52 = arith.constant 0 : index
    %c0_53 = arith.constant 0 : index
    %104 = vector.load %arg13[%c0_52, %c0_53] : memref<1x64xf32, #tpu.memory_space<vmem>>, vector<1x64xf32>
    %105 = vector.broadcast %104 : vector<1x64xf32> to vector<8x64xf32>
    %106 = arith.mulf %105, %101 : vector<8x64xf32>
    %107 = arith.addf %103, %106 : vector<8x64xf32>
    %108 = tpu.iota {dimensions = array<i32: 0>} : vector<8x64xi32>
    %c8_i32 = arith.constant 8 : i32
    %109 = arith.muli %arg1, %c8_i32 : i32
    %c20_i32 = arith.constant 20 : i32
    %110 = arith.subi %c20_i32, %109 : i32
    %111 = vector.broadcast %110 : i32 to vector<8x64xi32>
    %112 = arith.cmpi slt, %108, %111 : vector<8x64xi32>
    %cst_54 = arith.constant 0.000000e+00 : f32
    %113 = vector.broadcast %cst_54 : f32 to vector<8x64xf32>
    %114 = arith.select %112, %107, %113 : vector<8x64xi1>, vector<8x64xf32>
    %c0_55 = arith.constant 0 : index
    %c0_56 = arith.constant 0 : index
    %c0_57 = arith.constant 0 : index
    %115 = vector.load %arg14[%c0_55, %c0_56, %c0_57] : memref<1x8x64xf32, #tpu.memory_space<vmem>>, vector<1x8x64xf32>
    %116 = vector.shape_cast %115 : vector<1x8x64xf32> to vector<8x64xf32>
    %117 = vector.shape_cast %114 : vector<8x64xf32> to vector<1x8x64xf32>
    tpu.vector_store %arg14[%c0_55, %c0_56, %c0_57], %117 {strides = array<i32>} : memref<1x8x64xf32, #tpu.memory_space<vmem>>, vector<1x8x64xf32>,
    return
  }
  func.func @transform_0(%arg0: i32, %arg1: i32) -> (i32, i32, i32) {
    %c1_i32 = arith.constant 1 : i32
    %0 = arith.muli %arg1, %c1_i32 : i32
    %c1_i32_0 = arith.constant 1 : i32
    %1 = arith.subi %0, %c1_i32_0 : i32
    %c0_i32 = arith.constant 0 : i32
    %2 = arith.maxsi %1, %c0_i32 : i32
    %c0_i32_1 = arith.constant 0 : i32
    %c0_i32_2 = arith.constant 0 : i32
    return %arg0, %2, %c0_i32_1 : i32, i32, i32
  }
  func.func @transform_1(%arg0: i32, %arg1: i32) -> (i32, i32, i32) {
    %c0_i32 = arith.constant 0 : i32
    %c0_i32_0 = arith.constant 0 : i32
    return %arg0, %arg1, %c0_i32 : i32, i32, i32
  }
  func.func @transform_2(%arg0: i32, %arg1: i32) -> (i32, i32, i32) {
    %c1_i32 = arith.constant 1 : i32
    %0 = arith.addi %arg1, %c1_i32 : i32
    %c1_i32_0 = arith.constant 1 : i32
    %1 = arith.muli %0, %c1_i32_0 : i32
    %c2_i32 = arith.constant 2 : i32
    %2 = arith.minsi %1, %c2_i32 : i32
    %c0_i32 = arith.constant 0 : i32
    %c0_i32_1 = arith.constant 0 : i32
    return %arg0, %2, %c0_i32 : i32, i32, i32
  }
  func.func @transform_3(%arg0: i32, %arg1: i32) -> (i32, i32) {
    %c0_i32 = arith.constant 0 : i32
    %c0_i32_0 = arith.constant 0 : i32
    %c0_i32_1 = arith.constant 0 : i32
    return %c0_i32, %c0_i32_0 : i32, i32
  }
  func.func @transform_4(%arg0: i32, %arg1: i32) -> (i32, i32) {
    %c0_i32 = arith.constant 0 : i32
    %c0_i32_0 = arith.constant 0 : i32
    %c0_i32_1 = arith.constant 0 : i32
    return %c0_i32, %c0_i32_0 : i32, i32
  }
  func.func @transform_5(%arg0: i32, %arg1: i32) -> (i32, i32) {
    %c0_i32 = arith.constant 0 : i32
    %c0_i32_0 = arith.constant 0 : i32
    %c0_i32_1 = arith.constant 0 : i32
    return %c0_i32, %c0_i32_0 : i32, i32
  }
  func.func @transform_6(%arg0: i32, %arg1: i32) -> (i32, i32) {
    %c0_i32 = arith.constant 0 : i32
    %c0_i32_0 = arith.constant 0 : i32
    %c0_i32_1 = arith.constant 0 : i32
    return %c0_i32, %c0_i32_0 : i32, i32
  }
  func.func @transform_7(%arg0: i32, %arg1: i32) -> (i32, i32) {
    %c0_i32 = arith.constant 0 : i32
    %c0_i32_0 = arith.constant 0 : i32
    %c0_i32_1 = arith.constant 0 : i32
    return %c0_i32, %c0_i32_0 : i32, i32
  }
  func.func @transform_8(%arg0: i32, %arg1: i32) -> (i32, i32) {
    %c0_i32 = arith.constant 0 : i32
    %c0_i32_0 = arith.constant 0 : i32
    %c0_i32_1 = arith.constant 0 : i32
    return %c0_i32, %c0_i32_0 : i32, i32
  }
  func.func @transform_9(%arg0: i32, %arg1: i32) -> (i32, i32) {
    %c0_i32 = arith.constant 0 : i32
    %c0_i32_0 = arith.constant 0 : i32
    %c0_i32_1 = arith.constant 0 : i32
    return %c0_i32, %c0_i32_0 : i32, i32
  }
  func.func @transform_10(%arg0: i32, %arg1: i32) -> (i32, i32) {
    %c0_i32 = arith.constant 0 : i32
    %c0_i32_0 = arith.constant 0 : i32
    %c0_i32_1 = arith.constant 0 : i32
    return %c0_i32, %c0_i32_0 : i32, i32
  }
  func.func @transform_11(%arg0: i32, %arg1: i32) -> (i32, i32) {
    %c0_i32 = arith.constant 0 : i32
    %c0_i32_0 = arith.constant 0 : i32
    %c0_i32_1 = arith.constant 0 : i32
    return %c0_i32, %c0_i32_0 : i32, i32
  }
  func.func @transform_12(%arg0: i32, %arg1: i32) -> (i32, i32, i32) {
    %c0_i32 = arith.constant 0 : i32
    %c0_i32_0 = arith.constant 0 : i32
    return %arg0, %arg1, %c0_i32 : i32, i32, i32
  }
}

module attributes {stable_mosaic.version = 11 : i64} {
  func.func @embed_kernel(%arg0: i32, %arg1: i32, %arg2: memref<1x8x16xf32, #tpu.memory_space<vmem>>, %arg3: memref<1x8x16xf32, #tpu.memory_space<vmem>>, %arg4: memref<1x8x16xf32, #tpu.memory_space<vmem>>, %arg5: memref<7x16x64xbf16, #tpu.memory_space<vmem>>, %arg6: memref<1x64xf32, #tpu.memory_space<vmem>>, %arg7: memref<1x64xf32, #tpu.memory_space<vmem>>, %arg8: memref<1x64xf32, #tpu.memory_space<vmem>>, %arg9: memref<1x8x64xf32, #tpu.memory_space<vmem>>, %arg10: memref<24x16xf32, #tpu.memory_space<vmem>>) attributes {dimension_semantics = [#tpu.dimension_semantics<parallel>, #tpu.dimension_semantics<parallel>], iteration_bounds = array<i64: 2, 3>, scalar_prefetch = 0 : i64, scratch_operands = 1 : i64, tpu.core_type = #tpu.core_type<tc>, window_params = [{transform_indices = @transform_0, window_bounds = array<i64: 1, 8, 16>}, {transform_indices = @transform_1, window_bounds = array<i64: 1, 8, 16>}, {transform_indices = @transform_2, window_bounds = array<i64: 1, 8, 16>}, {pipeline_mode = #tpu.pipeline_mode<synchronous>, transform_indices = @transform_3, window_bounds = array<i64: 7, 16, 64>}, {pipeline_mode = #tpu.pipeline_mode<synchronous>, transform_indices = @transform_4, window_bounds = array<i64: 1, 64>}, {pipeline_mode = #tpu.pipeline_mode<synchronous>, transform_indices = @transform_5, window_bounds = array<i64: 1, 64>}, {pipeline_mode = #tpu.pipeline_mode<synchronous>, transform_indices = @transform_6, window_bounds = array<i64: 1, 64>}, {transform_indices = @transform_7, window_bounds = array<i64: 1, 8, 64>}]} {
    %c0 = arith.constant 0 : index
    %c0_0 = arith.constant 0 : index
    %c0_1 = arith.constant 0 : index
    %0 = vector.load %arg3[%c0, %c0_0, %c0_1] : memref<1x8x16xf32, #tpu.memory_space<vmem>>, vector<1x8x16xf32>
    %1 = vector.shape_cast %0 : vector<1x8x16xf32> to vector<8x16xf32>
    %c3 = arith.constant 3 : index
    %c0_2 = arith.constant 0 : index
    %2 = vector.load %arg10[%c3, %c0_2] : memref<24x16xf32, #tpu.memory_space<vmem>>, vector<8x16xf32>
    tpu.vector_store %arg10[%c3, %c0_2], %1 {strides = array<i32>} : memref<24x16xf32, #tpu.memory_space<vmem>>, vector<8x16xf32>,
    %c0_3 = arith.constant 0 : index
    %c5 = arith.constant 5 : index
    %c0_4 = arith.constant 0 : index
    %3 = vector.load %arg2[%c0_3, %c5, %c0_4] : memref<1x8x16xf32, #tpu.memory_space<vmem>>, vector<1x3x16xf32>
    %4 = vector.shape_cast %3 : vector<1x3x16xf32> to vector<3x16xf32>
    %c0_5 = arith.constant 0 : index
    %c0_6 = arith.constant 0 : index
    %5 = vector.load %arg10[%c0_5, %c0_6] : memref<24x16xf32, #tpu.memory_space<vmem>>, vector<3x16xf32>
    tpu.vector_store %arg10[%c0_5, %c0_6], %4 {strides = array<i32>} : memref<24x16xf32, #tpu.memory_space<vmem>>, vector<3x16xf32>,
    %c0_7 = arith.constant 0 : index
    %c0_8 = arith.constant 0 : index
    %c0_9 = arith.constant 0 : index
    %6 = vector.load %arg4[%c0_7, %c0_8, %c0_9] : memref<1x8x16xf32, #tpu.memory_space<vmem>>, vector<1x3x16xf32>
    %7 = vector.shape_cast %6 : vector<1x3x16xf32> to vector<3x16xf32>
    %c11 = arith.constant 11 : index
    %c0_10 = arith.constant 0 : index
    %8 = vector.load %arg10[%c11, %c0_10] : memref<24x16xf32, #tpu.memory_space<vmem>>, vector<3x16xf32>
    tpu.vector_store %arg10[%c11, %c0_10], %7 {strides = array<i32>} : memref<24x16xf32, #tpu.memory_space<vmem>>, vector<3x16xf32>,
    %c0_i32 = arith.constant 0 : i32
    %9 = arith.cmpi eq, %arg1, %c0_i32 : i32
    %10 = arith.extui %9 : i1 to i32
    %c0_i32_11 = arith.constant 0 : i32
    %11 = arith.cmpi ne, %10, %c0_i32_11 : i32
    scf.if %11 {
      %cst_65 = arith.constant 0.000000e+00 : f32
      %93 = vector.broadcast %cst_65 : f32 to vector<3x16xf32>
      %c0_66 = arith.constant 0 : index
      %c0_67 = arith.constant 0 : index
      %94 = vector.load %arg10[%c0_66, %c0_67] : memref<24x16xf32, #tpu.memory_space<vmem>>, vector<3x16xf32>
      tpu.vector_store %arg10[%c0_66, %c0_67], %93 {strides = array<i32>} : memref<24x16xf32, #tpu.memory_space<vmem>>, vector<3x16xf32>,
    } else {
    }
    %c2_i32 = arith.constant 2 : i32
    %12 = arith.cmpi eq, %arg1, %c2_i32 : i32
    %13 = arith.extui %12 : i1 to i32
    %c0_i32_12 = arith.constant 0 : i32
    %14 = arith.cmpi ne, %13, %c0_i32_12 : i32
    scf.if %14 {
      %cst_65 = arith.constant 0.000000e+00 : f32
      %93 = vector.broadcast %cst_65 : f32 to vector<3x16xf32>
      %c11_66 = arith.constant 11 : index
      %c0_67 = arith.constant 0 : index
      %94 = vector.load %arg10[%c11_66, %c0_67] : memref<24x16xf32, #tpu.memory_space<vmem>>, vector<3x16xf32>
      tpu.vector_store %arg10[%c11_66, %c0_67], %93 {strides = array<i32>} : memref<24x16xf32, #tpu.memory_space<vmem>>, vector<3x16xf32>,
    } else {
    }
    %c0_13 = arith.constant 0 : index
    %c0_14 = arith.constant 0 : index
    %15 = vector.load %arg6[%c0_13, %c0_14] : memref<1x64xf32, #tpu.memory_space<vmem>>, vector<1x64xf32>
    %c0_15 = arith.constant 0 : index
    %c0_16 = arith.constant 0 : index
    %16 = vector.load %arg10[%c0_15, %c0_16] : memref<24x16xf32, #tpu.memory_space<vmem>>, vector<8x16xf32>
    %17 = arith.truncf %16 : vector<8x16xf32> to vector<8x16xbf16>
    %c0_17 = arith.constant 0 : index
    %c0_18 = arith.constant 0 : index
    %c0_19 = arith.constant 0 : index
    %18 = vector.load %arg5[%c0_17, %c0_18, %c0_19] : memref<7x16x64xbf16, #tpu.memory_space<vmem>>, vector<1x16x64xbf16>
    %19 = vector.shape_cast %18 : vector<1x16x64xbf16> to vector<16x64xbf16>
    %cst = arith.constant dense<0.000000e+00> : vector<8x64xf32>
    %20 = tpu.matmul %17, %19, %cst {dimension_numbers = #tpu.dot_dimension_numbers<[1], [0], [0], [1], [0, 0, 1, 1], [], []>} : vector<8x16xbf16>, vector<16x64xbf16>, vector<8x64xf32> -> vector<8x64xf32>
    %21 = vector.broadcast %15 : vector<1x64xf32> to vector<8x64xf32>
    %22 = arith.addf %21, %20 : vector<8x64xf32>
    %c1 = arith.constant 1 : index
    %c0_20 = arith.constant 0 : index
    %23 = vector.load %arg10[%c1, %c0_20] : memref<24x16xf32, #tpu.memory_space<vmem>>, vector<8x16xf32>
    %24 = arith.truncf %23 : vector<8x16xf32> to vector<8x16xbf16>
    %c1_21 = arith.constant 1 : index
    %c0_22 = arith.constant 0 : index
    %c0_23 = arith.constant 0 : index
    %25 = vector.load %arg5[%c1_21, %c0_22, %c0_23] : memref<7x16x64xbf16, #tpu.memory_space<vmem>>, vector<1x16x64xbf16>
    %26 = vector.shape_cast %25 : vector<1x16x64xbf16> to vector<16x64xbf16>
    %cst_24 = arith.constant dense<0.000000e+00> : vector<8x64xf32>
    %27 = tpu.matmul %24, %26, %cst_24 {dimension_numbers = #tpu.dot_dimension_numbers<[1], [0], [0], [1], [0, 0, 1, 1], [], []>} : vector<8x16xbf16>, vector<16x64xbf16>, vector<8x64xf32> -> vector<8x64xf32>
    %28 = arith.addf %22, %27 : vector<8x64xf32>
    %c2 = arith.constant 2 : index
    %c0_25 = arith.constant 0 : index
    %29 = vector.load %arg10[%c2, %c0_25] : memref<24x16xf32, #tpu.memory_space<vmem>>, vector<8x16xf32>
    %30 = arith.truncf %29 : vector<8x16xf32> to vector<8x16xbf16>
    %c2_26 = arith.constant 2 : index
    %c0_27 = arith.constant 0 : index
    %c0_28 = arith.constant 0 : index
    %31 = vector.load %arg5[%c2_26, %c0_27, %c0_28] : memref<7x16x64xbf16, #tpu.memory_space<vmem>>, vector<1x16x64xbf16>
    %32 = vector.shape_cast %31 : vector<1x16x64xbf16> to vector<16x64xbf16>
    %cst_29 = arith.constant dense<0.000000e+00> : vector<8x64xf32>
    %33 = tpu.matmul %30, %32, %cst_29 {dimension_numbers = #tpu.dot_dimension_numbers<[1], [0], [0], [1], [0, 0, 1, 1], [], []>} : vector<8x16xbf16>, vector<16x64xbf16>, vector<8x64xf32> -> vector<8x64xf32>
    %34 = arith.addf %28, %33 : vector<8x64xf32>
    %c3_30 = arith.constant 3 : index
    %c0_31 = arith.constant 0 : index
    %35 = vector.load %arg10[%c3_30, %c0_31] : memref<24x16xf32, #tpu.memory_space<vmem>>, vector<8x16xf32>
    %36 = arith.truncf %35 : vector<8x16xf32> to vector<8x16xbf16>
    %c3_32 = arith.constant 3 : index
    %c0_33 = arith.constant 0 : index
    %c0_34 = arith.constant 0 : index
    %37 = vector.load %arg5[%c3_32, %c0_33, %c0_34] : memref<7x16x64xbf16, #tpu.memory_space<vmem>>, vector<1x16x64xbf16>
    %38 = vector.shape_cast %37 : vector<1x16x64xbf16> to vector<16x64xbf16>
    %cst_35 = arith.constant dense<0.000000e+00> : vector<8x64xf32>
    %39 = tpu.matmul %36, %38, %cst_35 {dimension_numbers = #tpu.dot_dimension_numbers<[1], [0], [0], [1], [0, 0, 1, 1], [], []>} : vector<8x16xbf16>, vector<16x64xbf16>, vector<8x64xf32> -> vector<8x64xf32>
    %40 = arith.addf %34, %39 : vector<8x64xf32>
    %c4 = arith.constant 4 : index
    %c0_36 = arith.constant 0 : index
    %41 = vector.load %arg10[%c4, %c0_36] : memref<24x16xf32, #tpu.memory_space<vmem>>, vector<8x16xf32>
    %42 = arith.truncf %41 : vector<8x16xf32> to vector<8x16xbf16>
    %c4_37 = arith.constant 4 : index
    %c0_38 = arith.constant 0 : index
    %c0_39 = arith.constant 0 : index
    %43 = vector.load %arg5[%c4_37, %c0_38, %c0_39] : memref<7x16x64xbf16, #tpu.memory_space<vmem>>, vector<1x16x64xbf16>
    %44 = vector.shape_cast %43 : vector<1x16x64xbf16> to vector<16x64xbf16>
    %cst_40 = arith.constant dense<0.000000e+00> : vector<8x64xf32>
    %45 = tpu.matmul %42, %44, %cst_40 {dimension_numbers = #tpu.dot_dimension_numbers<[1], [0], [0], [1], [0, 0, 1, 1], [], []>} : vector<8x16xbf16>, vector<16x64xbf16>, vector<8x64xf32> -> vector<8x64xf32>
    %46 = arith.addf %40, %45 : vector<8x64xf32>
    %c5_41 = arith.constant 5 : index
    %c0_42 = arith.constant 0 : index
    %47 = vector.load %arg10[%c5_41, %c0_42] : memref<24x16xf32, #tpu.memory_space<vmem>>, vector<8x16xf32>
    %48 = arith.truncf %47 : vector<8x16xf32> to vector<8x16xbf16>
    %c5_43 = arith.constant 5 : index
    %c0_44 = arith.constant 0 : index
    %c0_45 = arith.constant 0 : index
    %49 = vector.load %arg5[%c5_43, %c0_44, %c0_45] : memref<7x16x64xbf16, #tpu.memory_space<vmem>>, vector<1x16x64xbf16>
    %50 = vector.shape_cast %49 : vector<1x16x64xbf16> to vector<16x64xbf16>
    %cst_46 = arith.constant dense<0.000000e+00> : vector<8x64xf32>
    %51 = tpu.matmul %48, %50, %cst_46 {dimension_numbers = #tpu.dot_dimension_numbers<[1], [0], [0], [1], [0, 0, 1, 1], [], []>} : vector<8x16xbf16>, vector<16x64xbf16>, vector<8x64xf32> -> vector<8x64xf32>
    %52 = arith.addf %46, %51 : vector<8x64xf32>
    %c6 = arith.constant 6 : index
    %c0_47 = arith.constant 0 : index
    %53 = vector.load %arg10[%c6, %c0_47] : memref<24x16xf32, #tpu.memory_space<vmem>>, vector<8x16xf32>
    %54 = arith.truncf %53 : vector<8x16xf32> to vector<8x16xbf16>
    %c6_48 = arith.constant 6 : index
    %c0_49 = arith.constant 0 : index
    %c0_50 = arith.constant 0 : index
    %55 = vector.load %arg5[%c6_48, %c0_49, %c0_50] : memref<7x16x64xbf16, #tpu.memory_space<vmem>>, vector<1x16x64xbf16>
    %56 = vector.shape_cast %55 : vector<1x16x64xbf16> to vector<16x64xbf16>
    %cst_51 = arith.constant dense<0.000000e+00> : vector<8x64xf32>
    %57 = tpu.matmul %54, %56, %cst_51 {dimension_numbers = #tpu.dot_dimension_numbers<[1], [0], [0], [1], [0, 0, 1, 1], [], []>} : vector<8x16xbf16>, vector<16x64xbf16>, vector<8x64xf32> -> vector<8x64xf32>
    %58 = arith.addf %52, %57 : vector<8x64xf32>
    %c0_52 = arith.constant 0 : index
    %c0_53 = arith.constant 0 : index
    %59 = vector.load %arg7[%c0_52, %c0_53] : memref<1x64xf32, #tpu.memory_space<vmem>>, vector<1x64xf32>
    %c0_54 = arith.constant 0 : index
    %c0_55 = arith.constant 0 : index
    %60 = vector.load %arg8[%c0_54, %c0_55] : memref<1x64xf32, #tpu.memory_space<vmem>>, vector<1x64xf32>
    %cst_56 = arith.constant dense<0.000000e+00> : vector<8xf32>
    %61 = vector.multi_reduction <add>, %58, %cst_56 [1] : vector<8x64xf32> to vector<8xf32>
    %62 = vector.shape_cast %61 : vector<8xf32> to vector<8x1xf32>
    %cst_57 = arith.constant 6.400000e+01 : f32
    %63 = vector.broadcast %cst_57 : f32 to vector<8x1xf32>
    %64 = arith.divf %62, %63 : vector<8x1xf32>
    %65 = vector.broadcast %64 : vector<8x1xf32> to vector<8x64xf32>
    %66 = arith.subf %58, %65 : vector<8x64xf32>
    %67 = arith.mulf %66, %66 : vector<8x64xf32>
    %cst_58 = arith.constant dense<0.000000e+00> : vector<8xf32>
    %68 = vector.multi_reduction <add>, %67, %cst_58 [1] : vector<8x64xf32> to vector<8xf32>
    %69 = vector.shape_cast %68 : vector<8xf32> to vector<8x1xf32>
    %cst_59 = arith.constant 6.400000e+01 : f32
    %70 = vector.broadcast %cst_59 : f32 to vector<8x1xf32>
    %71 = arith.divf %69, %70 : vector<8x1xf32>
    %72 = vector.broadcast %64 : vector<8x1xf32> to vector<8x64xf32>
    %73 = arith.subf %58, %72 : vector<8x64xf32>
    %cst_60 = arith.constant 9.99999997E-7 : f32
    %74 = vector.broadcast %cst_60 : f32 to vector<8x1xf32>
    %75 = arith.addf %71, %74 : vector<8x1xf32>
    %76 = math.rsqrt %75 : vector<8x1xf32>
    %77 = vector.broadcast %76 : vector<8x1xf32> to vector<8x64xf32>
    %78 = arith.mulf %73, %77 : vector<8x64xf32>
    %79 = vector.broadcast %59 : vector<1x64xf32> to vector<8x64xf32>
    %80 = arith.mulf %78, %79 : vector<8x64xf32>
    %81 = vector.broadcast %60 : vector<1x64xf32> to vector<8x64xf32>
    %82 = arith.addf %80, %81 : vector<8x64xf32>
    %83 = tpu.iota {dimensions = array<i32: 0>} : vector<8x64xi32>
    %c8_i32 = arith.constant 8 : i32
    %84 = arith.muli %arg1, %c8_i32 : i32
    %c20_i32 = arith.constant 20 : i32
    %85 = arith.subi %c20_i32, %84 : i32
    %86 = vector.broadcast %85 : i32 to vector<8x64xi32>
    %87 = arith.cmpi slt, %83, %86 : vector<8x64xi32>
    %cst_61 = arith.constant 0.000000e+00 : f32
    %88 = vector.broadcast %cst_61 : f32 to vector<8x64xf32>
    %89 = arith.select %87, %82, %88 : vector<8x64xi1>, vector<8x64xf32>
    %c0_62 = arith.constant 0 : index
    %c0_63 = arith.constant 0 : index
    %c0_64 = arith.constant 0 : index
    %90 = vector.load %arg9[%c0_62, %c0_63, %c0_64] : memref<1x8x64xf32, #tpu.memory_space<vmem>>, vector<1x8x64xf32>
    %91 = vector.shape_cast %90 : vector<1x8x64xf32> to vector<8x64xf32>
    %92 = vector.shape_cast %89 : vector<8x64xf32> to vector<1x8x64xf32>
    tpu.vector_store %arg9[%c0_62, %c0_63, %c0_64], %92 {strides = array<i32>} : memref<1x8x64xf32, #tpu.memory_space<vmem>>, vector<1x8x64xf32>,
    return
  }
  func.func @transform_0(%arg0: i32, %arg1: i32) -> (i32, i32, i32) {
    %c1_i32 = arith.constant 1 : i32
    %0 = arith.muli %arg1, %c1_i32 : i32
    %c1_i32_0 = arith.constant 1 : i32
    %1 = arith.subi %0, %c1_i32_0 : i32
    %c0_i32 = arith.constant 0 : i32
    %2 = arith.maxsi %1, %c0_i32 : i32
    %c0_i32_1 = arith.constant 0 : i32
    %c0_i32_2 = arith.constant 0 : i32
    return %arg0, %2, %c0_i32_1 : i32, i32, i32
  }
  func.func @transform_1(%arg0: i32, %arg1: i32) -> (i32, i32, i32) {
    %c0_i32 = arith.constant 0 : i32
    %c0_i32_0 = arith.constant 0 : i32
    return %arg0, %arg1, %c0_i32 : i32, i32, i32
  }
  func.func @transform_2(%arg0: i32, %arg1: i32) -> (i32, i32, i32) {
    %c1_i32 = arith.constant 1 : i32
    %0 = arith.addi %arg1, %c1_i32 : i32
    %c1_i32_0 = arith.constant 1 : i32
    %1 = arith.muli %0, %c1_i32_0 : i32
    %c2_i32 = arith.constant 2 : i32
    %2 = arith.minsi %1, %c2_i32 : i32
    %c0_i32 = arith.constant 0 : i32
    %c0_i32_1 = arith.constant 0 : i32
    return %arg0, %2, %c0_i32 : i32, i32, i32
  }
  func.func @transform_3(%arg0: i32, %arg1: i32) -> (i32, i32, i32) {
    %c0_i32 = arith.constant 0 : i32
    %c0_i32_0 = arith.constant 0 : i32
    %c0_i32_1 = arith.constant 0 : i32
    %c0_i32_2 = arith.constant 0 : i32
    return %c0_i32, %c0_i32_0, %c0_i32_1 : i32, i32, i32
  }
  func.func @transform_4(%arg0: i32, %arg1: i32) -> (i32, i32) {
    %c0_i32 = arith.constant 0 : i32
    %c0_i32_0 = arith.constant 0 : i32
    %c0_i32_1 = arith.constant 0 : i32
    return %c0_i32, %c0_i32_0 : i32, i32
  }
  func.func @transform_5(%arg0: i32, %arg1: i32) -> (i32, i32) {
    %c0_i32 = arith.constant 0 : i32
    %c0_i32_0 = arith.constant 0 : i32
    %c0_i32_1 = arith.constant 0 : i32
    return %c0_i32, %c0_i32_0 : i32, i32
  }
  func.func @transform_6(%arg0: i32, %arg1: i32) -> (i32, i32) {
    %c0_i32 = arith.constant 0 : i32
    %c0_i32_0 = arith.constant 0 : i32
    %c0_i32_1 = arith.constant 0 : i32
    return %c0_i32, %c0_i32_0 : i32, i32
  }
  func.func @transform_7(%arg0: i32, %arg1: i32) -> (i32, i32, i32) {
    %c0_i32 = arith.constant 0 : i32
    %c0_i32_0 = arith.constant 0 : i32
    return %arg0, %arg1, %c0_i32 : i32, i32, i32
  }
}

module attributes {stable_mosaic.version = 11 : i64} {
  func.func @head_kernel(%arg0: i32, %arg1: i32, %arg2: memref<1x8x64xf32, #tpu.memory_space<vmem>>, %arg3: memref<1x64xf32, #tpu.memory_space<vmem>>, %arg4: memref<1x64xf32, #tpu.memory_space<vmem>>, %arg5: memref<64x128xbf16, #tpu.memory_space<vmem>>, %arg6: memref<1x128xf32, #tpu.memory_space<vmem>>, %arg7: memref<64x128xbf16, #tpu.memory_space<vmem>>, %arg8: memref<1x128xf32, #tpu.memory_space<vmem>>, %arg9: memref<128x16xbf16, #tpu.memory_space<vmem>>, %arg10: memref<128x16xbf16, #tpu.memory_space<vmem>>, %arg11: memref<1x8x16xf32, #tpu.memory_space<vmem>>) attributes {dimension_semantics = [#tpu.dimension_semantics<parallel>, #tpu.dimension_semantics<parallel>], iteration_bounds = array<i64: 2, 3>, scalar_prefetch = 0 : i64, scratch_operands = 0 : i64, tpu.core_type = #tpu.core_type<tc>, window_params = [{transform_indices = @transform_0, window_bounds = array<i64: 1, 8, 64>}, {pipeline_mode = #tpu.pipeline_mode<synchronous>, transform_indices = @transform_1, window_bounds = array<i64: 1, 64>}, {pipeline_mode = #tpu.pipeline_mode<synchronous>, transform_indices = @transform_2, window_bounds = array<i64: 1, 64>}, {pipeline_mode = #tpu.pipeline_mode<synchronous>, transform_indices = @transform_3, window_bounds = array<i64: 64, 128>}, {pipeline_mode = #tpu.pipeline_mode<synchronous>, transform_indices = @transform_4, window_bounds = array<i64: 1, 128>}, {pipeline_mode = #tpu.pipeline_mode<synchronous>, transform_indices = @transform_5, window_bounds = array<i64: 64, 128>}, {pipeline_mode = #tpu.pipeline_mode<synchronous>, transform_indices = @transform_6, window_bounds = array<i64: 1, 128>}, {pipeline_mode = #tpu.pipeline_mode<synchronous>, transform_indices = @transform_7, window_bounds = array<i64: 128, 16>}, {pipeline_mode = #tpu.pipeline_mode<synchronous>, transform_indices = @transform_8, window_bounds = array<i64: 128, 16>}, {transform_indices = @transform_9, window_bounds = array<i64: 1, 8, 16>}]} {
    %c0 = arith.constant 0 : index
    %c0_0 = arith.constant 0 : index
    %c0_1 = arith.constant 0 : index
    %0 = vector.load %arg2[%c0, %c0_0, %c0_1] : memref<1x8x64xf32, #tpu.memory_space<vmem>>, vector<1x8x64xf32>
    %1 = vector.shape_cast %0 : vector<1x8x64xf32> to vector<8x64xf32>
    %c0_2 = arith.constant 0 : index
    %c0_3 = arith.constant 0 : index
    %2 = vector.load %arg3[%c0_2, %c0_3] : memref<1x64xf32, #tpu.memory_space<vmem>>, vector<1x64xf32>
    %c0_4 = arith.constant 0 : index
    %c0_5 = arith.constant 0 : index
    %3 = vector.load %arg4[%c0_4, %c0_5] : memref<1x64xf32, #tpu.memory_space<vmem>>, vector<1x64xf32>
    %cst = arith.constant dense<0.000000e+00> : vector<8xf32>
    %4 = vector.multi_reduction <add>, %1, %cst [1] : vector<8x64xf32> to vector<8xf32>
    %5 = vector.shape_cast %4 : vector<8xf32> to vector<8x1xf32>
    %cst_6 = arith.constant 6.400000e+01 : f32
    %6 = vector.broadcast %cst_6 : f32 to vector<8x1xf32>
    %7 = arith.divf %5, %6 : vector<8x1xf32>
    %8 = vector.broadcast %7 : vector<8x1xf32> to vector<8x64xf32>
    %9 = arith.subf %1, %8 : vector<8x64xf32>
    %10 = arith.mulf %9, %9 : vector<8x64xf32>
    %cst_7 = arith.constant dense<0.000000e+00> : vector<8xf32>
    %11 = vector.multi_reduction <add>, %10, %cst_7 [1] : vector<8x64xf32> to vector<8xf32>
    %12 = vector.shape_cast %11 : vector<8xf32> to vector<8x1xf32>
    %cst_8 = arith.constant 6.400000e+01 : f32
    %13 = vector.broadcast %cst_8 : f32 to vector<8x1xf32>
    %14 = arith.divf %12, %13 : vector<8x1xf32>
    %15 = vector.broadcast %7 : vector<8x1xf32> to vector<8x64xf32>
    %16 = arith.subf %1, %15 : vector<8x64xf32>
    %cst_9 = arith.constant 9.99999997E-7 : f32
    %17 = vector.broadcast %cst_9 : f32 to vector<8x1xf32>
    %18 = arith.addf %14, %17 : vector<8x1xf32>
    %19 = math.rsqrt %18 : vector<8x1xf32>
    %20 = vector.broadcast %19 : vector<8x1xf32> to vector<8x64xf32>
    %21 = arith.mulf %16, %20 : vector<8x64xf32>
    %22 = vector.broadcast %2 : vector<1x64xf32> to vector<8x64xf32>
    %23 = arith.mulf %21, %22 : vector<8x64xf32>
    %24 = vector.broadcast %3 : vector<1x64xf32> to vector<8x64xf32>
    %25 = arith.addf %23, %24 : vector<8x64xf32>
    %26 = arith.truncf %25 : vector<8x64xf32> to vector<8x64xbf16>
    %c0_10 = arith.constant 0 : index
    %c0_11 = arith.constant 0 : index
    %27 = vector.load %arg5[%c0_10, %c0_11] : memref<64x128xbf16, #tpu.memory_space<vmem>>, vector<64x128xbf16>
    %cst_12 = arith.constant dense<0.000000e+00> : vector<8x128xf32>
    %28 = tpu.matmul %26, %27, %cst_12 {dimension_numbers = #tpu.dot_dimension_numbers<[1], [0], [0], [1], [0, 0, 1, 1], [], []>} : vector<8x64xbf16>, vector<64x128xbf16>, vector<8x128xf32> -> vector<8x128xf32>
    %c0_13 = arith.constant 0 : index
    %c0_14 = arith.constant 0 : index
    %29 = vector.load %arg6[%c0_13, %c0_14] : memref<1x128xf32, #tpu.memory_space<vmem>>, vector<1x128xf32>
    %30 = vector.broadcast %29 : vector<1x128xf32> to vector<8x128xf32>
    %31 = arith.addf %28, %30 : vector<8x128xf32>
    %c0_15 = arith.constant 0 : index
    %c0_16 = arith.constant 0 : index
    %32 = vector.load %arg7[%c0_15, %c0_16] : memref<64x128xbf16, #tpu.memory_space<vmem>>, vector<64x128xbf16>
    %cst_17 = arith.constant dense<0.000000e+00> : vector<8x128xf32>
    %33 = tpu.matmul %26, %32, %cst_17 {dimension_numbers = #tpu.dot_dimension_numbers<[1], [0], [0], [1], [0, 0, 1, 1], [], []>} : vector<8x64xbf16>, vector<64x128xbf16>, vector<8x128xf32> -> vector<8x128xf32>
    %c0_18 = arith.constant 0 : index
    %c0_19 = arith.constant 0 : index
    %34 = vector.load %arg8[%c0_18, %c0_19] : memref<1x128xf32, #tpu.memory_space<vmem>>, vector<1x128xf32>
    %35 = vector.broadcast %34 : vector<1x128xf32> to vector<8x128xf32>
    %36 = arith.addf %33, %35 : vector<8x128xf32>
    %37 = math.exp %31 : vector<8x128xf32>
    %cst_20 = arith.constant 1.000000e+02 : f32
    %38 = vector.broadcast %cst_20 : f32 to vector<8x128xf32>
    %39 = arith.minimumf %37, %38 : vector<8x128xf32>
    %40 = math.cos %36 : vector<8x128xf32>
    %41 = arith.mulf %39, %40 : vector<8x128xf32>
    %42 = arith.truncf %41 : vector<8x128xf32> to vector<8x128xbf16>
    %43 = math.sin %36 : vector<8x128xf32>
    %44 = arith.mulf %39, %43 : vector<8x128xf32>
    %45 = arith.truncf %44 : vector<8x128xf32> to vector<8x128xbf16>
    %c0_21 = arith.constant 0 : index
    %c0_22 = arith.constant 0 : index
    %46 = vector.load %arg9[%c0_21, %c0_22] : memref<128x16xbf16, #tpu.memory_space<vmem>>, vector<128x16xbf16>
    %cst_23 = arith.constant dense<0.000000e+00> : vector<8x16xf32>
    %47 = tpu.matmul %42, %46, %cst_23 {dimension_numbers = #tpu.dot_dimension_numbers<[1], [0], [0], [1], [0, 0, 1, 1], [], []>} : vector<8x128xbf16>, vector<128x16xbf16>, vector<8x16xf32> -> vector<8x16xf32>
    %c0_24 = arith.constant 0 : index
    %c0_25 = arith.constant 0 : index
    %48 = vector.load %arg10[%c0_24, %c0_25] : memref<128x16xbf16, #tpu.memory_space<vmem>>, vector<128x16xbf16>
    %cst_26 = arith.constant dense<0.000000e+00> : vector<8x16xf32>
    %49 = tpu.matmul %45, %48, %cst_26 {dimension_numbers = #tpu.dot_dimension_numbers<[1], [0], [0], [1], [0, 0, 1, 1], [], []>} : vector<8x128xbf16>, vector<128x16xbf16>, vector<8x16xf32> -> vector<8x16xf32>
    %50 = arith.addf %47, %49 : vector<8x16xf32>
    %51 = tpu.iota {dimensions = array<i32: 0>} : vector<8x16xi32>
    %c8_i32 = arith.constant 8 : i32
    %52 = arith.muli %arg1, %c8_i32 : i32
    %c20_i32 = arith.constant 20 : i32
    %53 = arith.subi %c20_i32, %52 : i32
    %54 = vector.broadcast %53 : i32 to vector<8x16xi32>
    %55 = arith.cmpi slt, %51, %54 : vector<8x16xi32>
    %cst_27 = arith.constant 0.000000e+00 : f32
    %56 = vector.broadcast %cst_27 : f32 to vector<8x16xf32>
    %57 = arith.select %55, %50, %56 : vector<8x16xi1>, vector<8x16xf32>
    %c0_28 = arith.constant 0 : index
    %c0_29 = arith.constant 0 : index
    %c0_30 = arith.constant 0 : index
    %58 = vector.load %arg11[%c0_28, %c0_29, %c0_30] : memref<1x8x16xf32, #tpu.memory_space<vmem>>, vector<1x8x16xf32>
    %59 = vector.shape_cast %58 : vector<1x8x16xf32> to vector<8x16xf32>
    %60 = vector.shape_cast %57 : vector<8x16xf32> to vector<1x8x16xf32>
    tpu.vector_store %arg11[%c0_28, %c0_29, %c0_30], %60 {strides = array<i32>} : memref<1x8x16xf32, #tpu.memory_space<vmem>>, vector<1x8x16xf32>,
    return
  }
  func.func @transform_0(%arg0: i32, %arg1: i32) -> (i32, i32, i32) {
    %c0_i32 = arith.constant 0 : i32
    %c0_i32_0 = arith.constant 0 : i32
    return %arg0, %arg1, %c0_i32 : i32, i32, i32
  }
  func.func @transform_1(%arg0: i32, %arg1: i32) -> (i32, i32) {
    %c0_i32 = arith.constant 0 : i32
    %c0_i32_0 = arith.constant 0 : i32
    %c0_i32_1 = arith.constant 0 : i32
    return %c0_i32, %c0_i32_0 : i32, i32
  }
  func.func @transform_2(%arg0: i32, %arg1: i32) -> (i32, i32) {
    %c0_i32 = arith.constant 0 : i32
    %c0_i32_0 = arith.constant 0 : i32
    %c0_i32_1 = arith.constant 0 : i32
    return %c0_i32, %c0_i32_0 : i32, i32
  }
  func.func @transform_3(%arg0: i32, %arg1: i32) -> (i32, i32) {
    %c0_i32 = arith.constant 0 : i32
    %c0_i32_0 = arith.constant 0 : i32
    %c0_i32_1 = arith.constant 0 : i32
    return %c0_i32, %c0_i32_0 : i32, i32
  }
  func.func @transform_4(%arg0: i32, %arg1: i32) -> (i32, i32) {
    %c0_i32 = arith.constant 0 : i32
    %c0_i32_0 = arith.constant 0 : i32
    %c0_i32_1 = arith.constant 0 : i32
    return %c0_i32, %c0_i32_0 : i32, i32
  }
  func.func @transform_5(%arg0: i32, %arg1: i32) -> (i32, i32) {
    %c0_i32 = arith.constant 0 : i32
    %c0_i32_0 = arith.constant 0 : i32
    %c0_i32_1 = arith.constant 0 : i32
    return %c0_i32, %c0_i32_0 : i32, i32
  }
  func.func @transform_6(%arg0: i32, %arg1: i32) -> (i32, i32) {
    %c0_i32 = arith.constant 0 : i32
    %c0_i32_0 = arith.constant 0 : i32
    %c0_i32_1 = arith.constant 0 : i32
    return %c0_i32, %c0_i32_0 : i32, i32
  }
  func.func @transform_7(%arg0: i32, %arg1: i32) -> (i32, i32) {
    %c0_i32 = arith.constant 0 : i32
    %c0_i32_0 = arith.constant 0 : i32
    %c0_i32_1 = arith.constant 0 : i32
    return %c0_i32, %c0_i32_0 : i32, i32
  }
  func.func @transform_8(%arg0: i32, %arg1: i32) -> (i32, i32) {
    %c0_i32 = arith.constant 0 : i32
    %c0_i32_0 = arith.constant 0 : i32
    %c0_i32_1 = arith.constant 0 : i32
    return %c0_i32, %c0_i32_0 : i32, i32
  }
  func.func @transform_9(%arg0: i32, %arg1: i32) -> (i32, i32, i32) {
    %c0_i32 = arith.constant 0 : i32
    %c0_i32_0 = arith.constant 0 : i32
    return %arg0, %arg1, %c0_i32 : i32, i32, i32
  }
}

</mosaic_0001>

<bundles_post_ra>
// kernel: vocos_vocoder_forward.4
= control target key start
LH: loop header
LB: loop body
LE: loop exit
PB: predicated region body
PF: predicated region fallthrough
CT: control target
= control target key end

     0   :  { %s1017_s24 = smov 0   ;;  %s1019_s25 = smov 0   ;;  %s1145_s0 = inlined_call_operand.vmem [shape: f32[2,24,16], index: 0, kind: input, shape index: {}, may-alias: {0,1,2}]   ;;  %s1146_s1 = inlined_call_operand.vmem [shape: f32[2,24,16], index: 1, kind: input, shape index: {}, may-alias: {0,1,2}]   ;;  %s1147_s2 = inlined_call_operand.vmem [shape: f32[2,24,16], index: 2, kind: input, shape index: {}, may-alias: {0,1,2}]   ;;  %s1148_s3 = inlined_call_operand.vmem [shape: bf16[7,16,64], index: 3, kind: input, shape index: {}]   ;;  %s1149_s4 = inlined_call_operand.vmem [shape: f32[1,64], index: 4, kind: input, shape index: {}]   ;;  %s1150_s5 = inlined_call_operand.vmem [shape: f32[1,64], index: 5, kind: input, shape index: {}]   ;;  %s1151_s6 = inlined_call_operand.vmem [shape: f32[1,64], index: 6, kind: input, shape index: {}]   ;;  %s1152_s7 = inlined_call_operand.vmem [shape: f32[2,24,64], index: 7, kind: output, shape index: {}]  }
   0x1   :  { %s1021_s26 = smov 0   ;;  %s1023_s27 = smov 0  }
   0x2   :  { %s1025_s28 = smov 0  }
   0x3 LB: > { %s26_s29 = sadd.s32 1, %s964_s26  ;;  %s29_s30 = sadd.s32 1, %s968_s27  ;;  %s972_s28 = sphi %s1025_s28, %s17_s28   ;;  %s968_s27 = sphi %s1023_s27, %s1157_s27   ;;  %s964_s26 = sphi %s1021_s26, %s1156_s26   ;;  %s960_s25 = sphi %s1019_s25, %s1155_s25   ;;  %s956_s24 = sphi %s1017_s24, %s1154_s24  }
   0x4   : > { %p27_p0 = scmp.ge.s32.totalorder %s26_s29, 3  ;;  %p808_p1 = scmp.ge.s32.totalorder %s972_s28, 1 }
   0x5   : > { %p310_p2 = scmp.lt.s32.totalorder %s972_s28, 7 }
   0x6   : > { %s1159_s29 = smov (%p27_p0, %s26_s29), 0  ;;  %s1161_s30 = smov (!%p27_p0, %s29_s30), %s968_s27 }
   0x7   : > { %p311_p3 = pnand %p808_p1, %p310_p2  ;;  %p31_p4 = scmp.ge.s32.totalorder %s1161_s30, 2 }
   0x8   : > { %p373_p5 = scmp.lt.s32.totalorder (!%p311_p3), %s960_s25, 1  ;;  %p386_p6 = scmp.lt.s32.totalorder (!%p311_p3), %s956_s24, 2 }
   0x9   : > { %s1163_s30 = smov (%p31_p4, %s1161_s30), 0  ;;  %314 = sbr.rel (%p311_p3) target bundleno = 465 (0x1d1), region = 48 }
   0xa   : > { %s809_s8 = sadd.s32 (!%p311_p3), 4294967295, %s956_s24  ;;  %s392_s9 = sadd.s32 (!%p311_p3), 1, %s956_s24 }
   0xb   : > { %p371_p7 = scmp.gt.s32.totalorder (!%p311_p3), %s809_s8, 0  ;;  %p1053_p8 = scmp.lt.s32.totalorder (!%p311_p3), %s392_s9, 2 }
   0xc   : > { %p810_p9 = scmp.lt.s32.totalorder (!%p311_p3), %s809_s8, 2  ;;  %p822_p10 = scmp.ne.s32.totalorder (!%p311_p3), %s956_s24, 0 }
   0xe   : > { %s1165_s25 = smov (!%p373_p5, %s960_s25), 1  ;;  %vm416_vm0 = vcmask 130048   ;;  %s1167_s8 = smov (!%p371_p7, %s809_s8), 0  ;;  %vm419_vm1 = vcmask 124928  }
   0xf   : > { %s387_s10 = scalar_select %p386_p6, %s956_s24, 2 }
  0x10   : > { %s883_s11 = smul.u32 3, %s1165_s25  ;;  %s1169_s9 = smov (!%p1053_p8, %s392_s9), 2 }
  0x11   : > { %s1171_s8 = smov (!%p810_p9, %s1167_s8), 2  ;;  %s1173_s9 = smov (!%p1053_p8, %s1169_s9), 2 }
  0x12   : > { %s389_s12 = sadd.s32 %s883_s11, %s387_s10  ;;  %s378_s21 = sadd.s32 %s883_s11, %s1171_s8 }
  0x13   : > { %s1057_s14 = sshll.u32 %s389_s12, 3  ;;  %s815_s22 = sshll.u32 %s378_s21, 3 }
  0x14   : > { %s391_s17 = scalar_lea.vmem %s1146_s1, %s1057_s14  ;;  %s413_s20 = scalar_lea.vmem %s1152_s7, %s1057_s14 }
  0x15   : > { %v415_v0 = vld [vmem:[%s391_s17] sm:$0xff]  ;;  %s400_s23 = sadd.s32 %s883_s11, %s1173_s9  ;;  %s380_s12 = scalar_lea.vmem %s1145_s0, %s815_s22 }
  0x16   : > { %417 = vst.msk [vmem:[#allocation2 + $0x3] sm:$0xff] %vm416_vm0, %v415_v0  ;;  %s820_s15 = sshll.u32 %s400_s23, 3  ;;  %v418_v1 = vld [vmem:[%s380_s12 + $0x5] sm:$0x7]  ;;  %426 = sbr.rel (%p822_p10) target bundleno = 29 (0x1d), region = 52 }
  0x17   : > { %s402_s18 = scalar_lea.vmem %s1147_s2, %s820_s15  ;;  %420 = vst.msk [vmem:[#allocation2] sm:$0x7] %vm419_vm1, %v418_v1 }
  0x18   : > { %v421_v2 = vld [vmem:[%s402_s18] sm:$0x7] }
  0x19   : > { %422 = vst.msk [vmem:[#allocation2 + $0xb] sm:$0x7] %vm419_vm1, %v421_v2 }
  0x1b   : > { %v974_v3 = vmov 0.0  }
  0x1c   : > { %427 = vst.msk [vmem:[#allocation2] sm:$0x7] %vm419_vm1, %v974_v3 }
  0x1d PF: > { %p823_p11 = scmp.ne.s32.totalorder %s956_s24, 2 }
  0x1f   : > { %431 = sbr.rel (%p823_p11) target bundleno = 38 (0x26), region = 56 }
  0x24   : > { %v975_v4 = vmov 0.0  }
  0x25   : > { %432 = vst.msk [vmem:[#allocation2 + $0xb] sm:$0x7] %vm419_vm1, %v975_v4 }
  0x26 PF: > { %v876_v5 = vld [vmem:[%s1148_s3] sm:$0xff]  ;;  %v877_v6 = vld [vmem:[%s1148_s3 + $0x8] sm:$0xff]  ;;  %v878_v7 = vld [vmem:[%s1148_s3 + $0x10] sm:$0xff]  ;;  %vm634_vm2 = vcmask 523264   ;;  %v976_v49 = vmov 64.0   ;;  %s871_s9 = sshll.u32 %s956_s24, 3  ;;  %v672_v4 = vlaneseq }
  0x27   : > { %v879_v8 = vld [vmem:[%s1148_s3 + $0x18] sm:$0xff]  ;;  %v434_v9 = vld [vmem:[#allocation2] sm:$0xff]  ;;  %454 = vmatpush.bf16.msra.mxu0 %v876_v5  ;;  %485 = vmatpush.bf16.msra.mxu1 %v877_v6  ;;  %v882_v14 = vld [vmem:[%s1148_s3 + $0x30] sm:$0xff]  ;;  %930 = vrcp.f32 %v976_v49  ;;  %s675_s11 = ssub.s32 20, %s871_s9 }
  0x28   : > { %v464_v10 = vld [vmem:[#allocation2 + $0x1] sm:$0xff]  ;;  %v435_v11 = vpack.c.bf16 %v434_v9, %v434_v9  ;;  %513 = vmatpush.bf16.msra.mxu2 %v878_v7  ;;  %541 = vmatpush.bf16.msra.mxu3 %v879_v8  ;;  %v927_v27 = vld [vmem:[%s1149_s4] ss:$0 sm:$0xff]  ;;  %v673_v8 = vshrl.u32 %v672_v4, 7 }
  0x29   : > { %v465_v12 = vpack.c.bf16 %v464_v10, %v464_v10  ;;  %v492_v13 = vld [vmem:[#allocation2 + $0x2] sm:$0xff]  ;;  %v928_v7 = vld [vmem:[%s1150_s5] ss:$0 sm:$0xff] }
  0x2a   : > { %v520_v15 = vld [vmem:[#allocation2 + $0x3] sm:$0xff]  ;;  %v493_v16 = vpack.c.bf16 %v492_v13, %v492_v13  ;;  %828 = vmatmul.msk.bf16.vlgmr.msra.gmra.mxu0 %vm416_vm0, %v435_v11  ;;  %v929_v10 = vld [vmem:[%s1151_s6] ss:$0 sm:$0xff]  ;;  %v676_v11 = vstv %s675_s11 }
  0x2b   : > { %v521_v17 = vpack.c.bf16 %v520_v15, %v520_v15  ;;  %v880_v18 = vld [vmem:[%s1148_s3 + $0x20] sm:$0xff]  ;;  %v881_v19 = vld [vmem:[%s1148_s3 + $0x28] sm:$0xff]  ;;  %835 = vmatmul.msk.bf16.vlgmr.msra.gmra.mxu1 %vm416_vm0, %v465_v12  ;;  %vm677_vm7 = vcmp.lt.s32.totalorder %v673_v8, %v676_v11 }
  0x2c   : > { %625 = vmatpush.bf16.msrb.mxu2 %v882_v14  ;;  %569 = vmatpush.bf16.msrb.mxu0 %v880_v18  ;;  %v548_v20 = vld [vmem:[#allocation2 + $0x4] sm:$0xff] }
  0x2d   : > { %842 = vmatmul.msk.bf16.vlgmr.msra.gmra.mxu2 %vm416_vm0, %v493_v16  ;;  %849 = vmatmul.msk.bf16.vlgmr.msra.gmra.mxu3 %vm416_vm0, %v521_v17  ;;  %v576_v21 = vld [vmem:[#allocation2 + $0x5] sm:$0xff]  ;;  %v549_v23 = vpack.c.bf16 %v548_v20, %v548_v20  ;;  %v931_v50 = vpop.eup %930 }
  0x2e   : > { %597 = vmatpush.bf16.msrb.mxu1 %v881_v19  ;;  %v604_v22 = vld [vmem:[#allocation2 + $0x6] sm:$0xff]  ;;  %v577_v24 = vpack.c.bf16 %v576_v21, %v576_v21  ;;  %v639_v51 = vmul.f32 64.0, %v931_v50  ;;  %vm643_vm3 = vweird.f32 %v931_v50 }
  0x2f   : > { %v605_v25 = vpack.c.bf16 %v604_v22, %v604_v22 }
  0x30   : > { %v640_v52 = vsub.f32 1.0, %v639_v51 }
  0x32   : > { %v641_v53 = vmul.f32 %v931_v50, %v640_v52 }
  0x34   : > { %v642_v54 = vadd.f32 %v931_v50, %v641_v53 }
  0x36   : > { %v644_v55 = vsel %vm643_vm3, %v931_v50, %v642_v54 }
  0x3a   : > { %856 = vmatmul.msk.bf16.vlgmr.msrb.gmra.mxu0 %vm416_vm0, %v549_v23 }
  0x3b   : > { %863 = vmatmul.msk.bf16.vlgmr.msrb.gmra.mxu1 %vm416_vm0, %v577_v24 }
  0x3d   : > { %870 = vmatmul.msk.bf16.vlgmr.msrb.gmra.mxu2 %vm416_vm0, %v605_v25 }
  0xa7   : > { %v456_v26 = vpop.f32.mrf.mxu0 }
  0xa8   : > { %v487_v28 = vpop.f32.mrf.mxu1  ;;  %v463_v29 = vadd.f32 %v927_v27, %v456_v26 }
  0xaa   : > { %v491_v32 = vadd.f32 %v487_v28, %v463_v29 }
  0xaf   : > { %v458_v33 = vpop.f32.mrf.mxu0 }
  0xb0   : > { %v515_v30 = vpop.f32.mrf.mxu2  ;;  %v543_v31 = vpop.f32.mrf.mxu3 }
  0xb1   : > { %v489_v34 = vpop.f32.mrf.mxu1  ;;  %v519_v35 = vadd.f32 %v515_v30, %v491_v32 }
  0xb3   : > { %v547_v38 = vadd.f32 %v543_v31, %v519_v35 }
  0xb7   : > { %v571_v39 = vpop.f32.mrf.mxu0 }
  0xb8   : > { %v517_v36 = vpop.f32.mrf.mxu2  ;;  %v545_v37 = vpop.f32.mrf.mxu3  ;;  %v575_v41 = vadd.f32 %v571_v39, %v547_v38 }
  0xb9   : > { %v599_v40 = vpop.f32.mrf.mxu1 }
  0xba   : > { %v603_v42 = vadd.f32 %v599_v40, %v575_v41 }
  0xbf   : > { %v573_v45 = vpop.f32.mrf.mxu0 }
  0xc0   : > { %v627_v43 = vpop.f32.mrf.mxu2 }
  0xc1   : > { %v631_v44 = vadd.f32 %v627_v43, %v603_v42  ;;  %v601_v46 = vpop.f32.mrf.mxu1 }
  0xc3   : > { %v635_v47 = vsel %vm634_vm2, %v631_v44, 0.0 }
  0xc4   : > { %636 = vadd.xlane.f32.xlu0 %v635_v47 }
  0xc8   : > { %v629_v48 = vpop.f32.mrf.mxu2 }
 0x137   : > { %v637_v56 = vpop.xlane.xlu0 %636 }
 0x138   : > { %v645_v57 = vmul.f32 %v644_v55, %v637_v56 }
 0x13a   : > { %v646_v58 = vsub.f32 %v631_v44, %v645_v57 }
 0x13c   : > { %v647_v59 = vmul.f32 %v646_v58, %v646_v58 }
 0x13e   : > { %v648_v60 = vsel %vm634_vm2, %v647_v59, 0.0 }
 0x13f   : > { %649 = vadd.xlane.f32.xlu0 %v648_v60 }
 0x1b2   : > { %v650_v61 = vpop.xlane.xlu0 %649 }
 0x1b3   : > { %v651_v62 = vmul.f32 %v650_v61, %v644_v55 }
 0x1b5   : > { %v652_v63 = vadd.f32 1e-06, %v651_v62 }
 0x1b7   : > { %932 = vrsqrt.f32 %v652_v63  ;;  %vm659_vm5 = vweird.f32 %v652_v63 }
 0x1bd   : > { %v933_v0 = vpop.eup %932 }
 0x1be   : > { %v654_v1 = vmul.f32 %v933_v0, %v652_v63  ;;  %vm660_vm4 = vweird.f32 %v933_v0 }
 0x1bf   : > { %vm661_vm6 = vmor %vm659_vm5, %vm660_vm4 }
 0x1c0   : > { %v655_v2 = vmul.f32 %v933_v0, %v654_v1 }
 0x1c2   : > { %v656_v3 = vmul.f32 0.5, %v655_v2 }
 0x1c4   : > { %v657_v5 = vsub.f32 1.5, %v656_v3 }
 0x1c6   : > { %v658_v6 = vmul.f32 %v933_v0, %v657_v5 }
 0x1c8   : > { %v662_v9 = vsel %vm661_vm6, %v933_v0, %v658_v6 }
 0x1c9   : > { %v663_v12 = vmul.f32 %v662_v9, %v646_v58 }
 0x1cb   : > { %v667_v13 = vmul.f32 %v928_v7, %v663_v12 }
 0x1cd   : > { %v671_v14 = vadd.f32 %v929_v10, %v667_v13 }
 0x1cf   : > { %v678_v15 = vsel %vm677_vm7, %v671_v14, 0.0 }
 0x1d0   : > { %679 = vst.msk [vmem:[%s413_s20] sm:$0xff] %vm634_vm2, %v678_v15 }
 0x1d1 PF: > { %s17_s28 = sadd.s32 1, %s972_s28   ;;  %s1154_s24 = smov %s964_s26 }
 0x1d2   : > { %p14_p12 = scmp.ge.s32.totalorder %s17_s28, 8   ;;  %s1155_s25 = smov %s968_s27 }
 0x1d3   : > { %s1156_s26 = smov %s1159_s29  ;;  %s1157_s27 = smov %s1163_s30 }
 0x1d4   :  { %16 = sbr.rel (!%p14_p12) target bundleno = 3 (0x3), region = 98 }

// kernel: vocos_vocoder_forward.7
= control target key start
LH: loop header
LB: loop body
LE: loop exit
PB: predicated region body
PF: predicated region fallthrough
CT: control target
= control target key end

     0   :  { %s1368_s30 = smov 0   ;;  %s1370_s10 = smov 0   ;;  %s1587_s0 = inlined_call_operand.vmem [shape: f32[2,24,64], index: 0, kind: input, shape index: {}]   ;;  %s1588_s1 = inlined_call_operand.vmem [shape: f32[1,64], index: 1, kind: input, shape index: {}]   ;;  %s1589_s2 = inlined_call_operand.vmem [shape: f32[1,64], index: 2, kind: input, shape index: {}]   ;;  %s1590_s3 = inlined_call_operand.vmem [shape: bf16[64,128], index: 3, kind: input, shape index: {}]   ;;  %s1591_s4 = inlined_call_operand.vmem [shape: f32[1,128], index: 4, kind: input, shape index: {}]   ;;  %s1592_s5 = inlined_call_operand.vmem [shape: bf16[64,128], index: 5, kind: input, shape index: {}]   ;;  %s1593_s6 = inlined_call_operand.vmem [shape: f32[1,128], index: 6, kind: input, shape index: {}]   ;;  %s1594_s7 = inlined_call_operand.vmem [shape: bf16[128,16], index: 7, kind: input, shape index: {}]   ;;  %s1595_s8 = inlined_call_operand.vmem [shape: bf16[128,16], index: 8, kind: input, shape index: {}]   ;;  %s1596_s9 = inlined_call_operand.vmem [shape: f32[2,24,16], index: 9, kind: output, shape index: {}]  }
   0x1   :  { %s1372_s11 = smov 0   ;;  %s1374_s12 = smov 0  }
   0x2   :  { %s1376_s13 = smov 0  }
   0x3 LB: > { %s28_s14 = sadd.s32 1, %s1300_s11  ;;  %s31_s15 = sadd.s32 1, %s1304_s12  ;;  %s1308_s13 = sphi %s1376_s13, %s19_s13   ;;  %s1304_s12 = sphi %s1374_s12, %s1600_s12   ;;  %s1300_s11 = sphi %s1372_s11, %s1599_s11   ;;  %s1296_s10 = sphi %s1370_s10, %s1598_s10   ;;  %s1292_s30 = sphi %s1368_s30, %s1597_s30  }
   0x4   : > { %p29_p0 = scmp.ge.s32.totalorder %s28_s14, 3  ;;  %p1077_p1 = scmp.ge.s32.totalorder %s1308_s13, 1 }
   0x5   : > { %p306_p2 = scmp.lt.s32.totalorder %s1308_s13, 7 }
   0x6   : > { %s1602_s14 = smov (%p29_p0, %s28_s14), 0  ;;  %s1604_s15 = smov (!%p29_p0, %s31_s15), %s1304_s12 }
   0x7   : > { %p307_p3 = pnand %p1077_p1, %p306_p2  ;;  %p33_p4 = scmp.ge.s32.totalorder %s1604_s15, 2 }
   0x8   : > { %p348_p5 = scmp.lt.s32.totalorder (!%p307_p3), %s1296_s10, 1  ;;  %p350_p6 = scmp.lt.s32.totalorder (!%p307_p3), %s1292_s30, 2 }
   0x9   : > { %s1606_s15 = smov (%p33_p4, %s1604_s15), 0  ;;  %310 = sbr.rel (%p307_p3) target bundleno = 660 (0x294), region = 56 }
   0xa   : > { %s1184_s27 = sshll.u32 (!%p307_p3), %s1292_s30, 3 }
   0xb   : > { %s981_s28 = ssub.s32 (!%p307_p3), 20, %s1184_s27 }
   0xe   : > { %s1608_s10 = smov (!%p348_p5, %s1296_s10), 1  ;;  %vm368_vm0 = vcmask 523264   ;;  %v1310_v2 = vmov 64.0   ;;  %v1190_v14 = vld [vmem:[%s1590_s3 + $0x18] sm:$0xff]  ;;  %v1189_v16 = vld [vmem:[%s1590_s3 + $0x10] sm:$0xff]  ;;  %v1188_v18 = vld [vmem:[%s1590_s3 + $0x8] sm:$0xff] }
   0xf   : > { %s351_s16 = scalar_select %p350_p6, %s1292_s30, 2  ;;  %1264 = vrcp.f32 %v1310_v2  ;;  %v1194_v15 = vld [vmem:[%s1592_s5 + $0x18] sm:$0xff]  ;;  %450 = vmatpush.bf16.msra.mxu0 %v1190_v14  ;;  %v1193_v17 = vld [vmem:[%s1592_s5 + $0x10] sm:$0xff]  ;;  %v1192_v19 = vld [vmem:[%s1592_s5 + $0x8] sm:$0xff] }
  0x10   : > { %s1211_s17 = smul.u32 3, %s1608_s10  ;;  %499 = vmatpush.bf16.msra.mxu1 %v1194_v15  ;;  %v1187_v20 = vld [vmem:[%s1590_s3] sm:$0xff]  ;;  %v1210_v42 = vld [vmem:[%s1595_s8 + $0x38] sm:$0xff]  ;;  %v1209_v45 = vld [vmem:[%s1595_s8 + $0x30] sm:$0xff]  ;;  %v1316_v15 = vmov 1326507024  }
  0x11   : > { %v1191_v21 = vld [vmem:[%s1592_s5] sm:$0xff]  ;;  %v1202_v43 = vld [vmem:[%s1594_s7 + $0x38] sm:$0xff]  ;;  %904 = vmatpush.bf16.msra.mxu2 %v1210_v42  ;;  %v1201_v46 = vld [vmem:[%s1594_s7 + $0x30] sm:$0xff] }
  0x12   : > { %s1402_s18 = sadd.s32 %s1211_s17, %s351_s16  ;;  %v1260_v31 = vld [vmem:[%s1588_s1] ss:$0 sm:$0xff]  ;;  %965 = vmatpush.bf16.msra.mxu3 %v1202_v43  ;;  %v1208_v49 = vld [vmem:[%s1595_s8 + $0x28] sm:$0xff]  ;;  %v1206_v61 = vld [vmem:[%s1595_s8 + $0x18] sm:$0xff] }
  0x13   : > { %s1078_s19 = sshll.u32 %s1402_s18, 3  ;;  %451 = vmatpush.bf16.msra.mxu0 %v1189_v16  ;;  %v1261_v34 = vld [vmem:[%s1589_s2] ss:$0 sm:$0xff]  ;;  %v1200_v50 = vld [vmem:[%s1594_s7 + $0x28] sm:$0xff]  ;;  %v1198_v62 = vld [vmem:[%s1594_s7 + $0x18] sm:$0xff] }
  0x14   : > { %s355_s22 = scalar_lea.vmem %s1587_s0, %s1078_s19  ;;  %500 = vmatpush.bf16.msra.mxu1 %v1193_v17  ;;  %v1263_v38 = vld [vmem:[%s1593_s6] ss:$0 sm:$0xff]  ;;  %s363_s16 = scalar_lea.vmem %s1596_s9, %s1078_s19 }
  0x15   : > { %v365_v0 = vld [vmem:[%s355_s22] sm:$0xff]  ;;  %v1265_v3 = vpop.eup %1264  ;;  %905 = vmatpush.bf16.msra.mxu2 %v1209_v45 }
  0x16   : > { %v369_v1 = vsel %vm368_vm0, %v365_v0, 0.0  ;;  %v373_v4 = vmul.f32 64.0, %v1265_v3  ;;  %vm377_vm1 = vweird.f32 %v1265_v3  ;;  %966 = vmatpush.bf16.msra.mxu3 %v1201_v46  ;;  %v1207_v55 = vld [vmem:[%s1595_s8 + $0x20] sm:$0xff] }
  0x17   : > { %370 = vadd.xlane.f32.xlu0 %v369_v1  ;;  %452 = vmatpush.bf16.msra.mxu0 %v1188_v18  ;;  %v1199_v56 = vld [vmem:[%s1594_s7 + $0x20] sm:$0xff]  ;;  %v1311_v1 = vmov 683565275  }
  0x18   : > { %v374_v5 = vsub.f32 1.0, %v373_v4  ;;  %501 = vmatpush.bf16.msra.mxu1 %v1192_v19  ;;  %v1203_v45 = vld [vmem:[%s1595_s8] sm:$0xff] }
  0x19   : > { %906 = vmatpush.bf16.msra.mxu2 %v1208_v49 }
  0x1a   : > { %v375_v6 = vmul.f32 %v1265_v3, %v374_v5  ;;  %967 = vmatpush.bf16.msra.mxu3 %v1200_v50 }
  0x1b   : > { %453 = vmatpush.bf16.msra.mxu0 %v1187_v20  ;;  %v1205_v20 = vld [vmem:[%s1595_s8 + $0x10] sm:$0xff] }
  0x1c   : > { %v376_v7 = vadd.f32 %v1265_v3, %v375_v6  ;;  %502 = vmatpush.bf16.msra.mxu1 %v1191_v21  ;;  %v1313_v6 = vmov 2131351028   ;;  %v1197_v21 = vld [vmem:[%s1594_s7 + $0x10] sm:$0xff] }
  0x1d   : > { %907 = vmatpush.bf16.msra.mxu2 %v1207_v55 }
  0x1e   : > { %v378_v8 = vsel %vm377_vm1, %v1265_v3, %v376_v7  ;;  %968 = vmatpush.bf16.msra.mxu3 %v1199_v56  ;;  %v1312_v3 = vmov 2475754826  }
  0x21   : > { %908 = vmatpush.bf16.msra.mxu2 %v1206_v61 }
  0x22   : > { %969 = vmatpush.bf16.msra.mxu3 %v1198_v62 }
  0x25   : > { %909 = vmatpush.bf16.msra.mxu2 %v1205_v20 }
  0x26   : > { %970 = vmatpush.bf16.msra.mxu3 %v1197_v21 }
  0x8a   : > { %v371_v9 = vpop.xlane.xlu0 %370 }
  0x8b   : > { %v379_v10 = vmul.f32 %v378_v8, %v371_v9  ;;  %v1314_v9 = vmov 2102212464  }
  0x8d   : > { %v380_v11 = vsub.f32 %v365_v0, %v379_v10 }
  0x8f   : > { %v381_v12 = vmul.f32 %v380_v11, %v380_v11 }
  0x91   : > { %v382_v13 = vsel %vm368_vm0, %v381_v12, 0.0  ;;  %v1315_v12 = vmov 920167782  }
  0x92   : > { %383 = vadd.xlane.f32.xlu0 %v382_v13 }
 0x105   : > { %v384_v22 = vpop.xlane.xlu0 %383 }
 0x106   : > { %v385_v23 = vmul.f32 %v384_v22, %v378_v8 }
 0x108   : > { %v386_v24 = vadd.f32 1e-06, %v385_v23 }
 0x10a   : > { %1266 = vrsqrt.f32 %v386_v24  ;;  %vm393_vm3 = vweird.f32 %v386_v24 }
 0x110   : > { %v1267_v25 = vpop.eup %1266 }
 0x111   : > { %v388_v26 = vmul.f32 %v1267_v25, %v386_v24  ;;  %vm394_vm2 = vweird.f32 %v1267_v25 }
 0x112   : > { %vm395_vm4 = vmor %vm393_vm3, %vm394_vm2 }
 0x113   : > { %v389_v27 = vmul.f32 %v1267_v25, %v388_v26 }
 0x115   : > { %v390_v28 = vmul.f32 0.5, %v389_v27 }
 0x117   : > { %v391_v29 = vsub.f32 1.5, %v390_v28 }
 0x119   : > { %v392_v30 = vmul.f32 %v1267_v25, %v391_v29 }
 0x11b   : > { %v396_v32 = vsel %vm395_vm4, %v1267_v25, %v392_v30 }
 0x11c   : > { %v397_v33 = vmul.f32 %v396_v32, %v380_v11 }
 0x11e   : > { %v401_v35 = vmul.f32 %v1260_v31, %v397_v33  ;;  %v1204_v31 = vld [vmem:[%s1595_s8 + $0x8] sm:$0xff] }
 0x11f   : > { %910 = vmatpush.bf16.msra.mxu2 %v1204_v31 }
 0x120   : > { %v405_v36 = vadd.f32 %v1261_v34, %v401_v35 }
 0x122   : > { %v406_v37 = vpack.c.bf16 %v405_v36, %v405_v36  ;;  %v1196_v36 = vld [vmem:[%s1594_s7 + $0x8] sm:$0xff] }
 0x123   : > { %971 = vmatpush.bf16.msra.mxu3 %v1196_v36  ;;  %911 = vmatpush.bf16.msra.mxu2 %v1203_v45 }
 0x124   : > { %1096 = vmatmul.msk.bf16.vlgmr.msra.gmra.mxu0 %vm368_vm0, %v406_v37  ;;  %1113 = vmatmul.msk.bf16.vlgmr.msra.gmra.mxu1 %vm368_vm0, %v406_v37 }
 0x1a1   : > { %v1447_v39 = vpop.f32.mrf.mxu0  ;;  %v504_v40 = vpop.f32.mrf.mxu1 }
 0x1a2   : > { %v1449_v41 = vadd.f32 %v1263_v38, %v504_v40 }
 0x1a4   : > { %v514_v44 = vand.u32 2139095040, %v1449_v41  ;;  %v511_v51 = vand.u32 2147483647, %v1449_v41  ;;  %vm513_vm1 = vcmp.lt.s32.totalorder %v1449_v41, 0 }
 0x1a6   : > { %v515_v47 = vshrl.u32 %v514_v44, 23  ;;  %v518_v57 = vand.u32 8388607, %v511_v51  ;;  %vm512_vm2 = vcmp.le.f32.partialorder %v511_v51, 0.7853982 }
 0x1a8   : > { %v1114_v48 = vadd.s32 4294967169, %v515_v47  ;;  %v519_v63 = vor.u32 8388608, %v518_v57 }
 0x1a9   : > { %v457_v52 = vpop.f32.mrf.mxu0  ;;  %v506_v53 = vpop.f32.mrf.mxu1 }
 0x1aa   : > { %v521_v54 = vadd.s32 1, %v1114_v48  ;;  %v1506_v24 = vshll.u32 %v519_v63, 8  ;;  %v1195_v48 = vld [vmem:[%s1594_s7] sm:$0xff] }
 0x1ab   : > { %972 = vmatpush.bf16.msra.mxu3 %v1195_v48 }
 0x1ac   : > { %vm522_vm5 = vcmp.gt.s32.totalorder %v521_v54, 0  ;;  %v560_v34 = vand.u32 65535, %v1506_v24  ;;  %v561_v35 = vshrl.u32 %v1506_v24, 16 }
 0x1ad   : > { %v523_v58 = vsel %vm522_vm5, %v521_v54, 0 }
 0x1ae   : > { %v525_v59 = vand.u32 31, %v523_v58  ;;  %v1487_v0 = vshrl.u32 %v523_v58, 5  ;;  %v1317_v58 = vmov 0  }
 0x1b0   : > { %v1479_v60 = vsub.s32 32, %v525_v59  ;;  %v528_v2 = vshll.u32 %v1311_v1, %v525_v59  ;;  %v531_v4 = vshll.u32 %v1312_v3, %v525_v59  ;;  %v534_v8 = vshll.u32 %v1313_v6, %v525_v59 }
 0x1b1   : > { %v537_v11 = vshll.u32 %v1314_v9, %v525_v59  ;;  %v540_v14 = vshll.u32 %v1315_v12, %v525_v59  ;;  %vm543_vm6 = vcmp.lt.s32.totalorder %v1487_v0, 1  ;;  %vm546_vm7 = vcmp.lt.s32.totalorder %v1487_v0, 4 }
 0x1b2   : > { %v529_v5 = vshrl.u32 %v1312_v3, %v1479_v60  ;;  %v532_v7 = vshrl.u32 %v1313_v6, %v1479_v60  ;;  %v535_v10 = vshrl.u32 %v1314_v9, %v1479_v60  ;;  %v538_v13 = vshrl.u32 %v1315_v12, %v1479_v60 }
 0x1b3   : > { %v541_v16 = vshrl.u32 %v1316_v15, %v1479_v60  ;;  %vm545_vm8 = vcmp.lt.s32.totalorder %v1487_v0, 3  ;;  %vm544_vm9 = vcmp.lt.s32.totalorder %v1487_v0, 2  ;;  %v527_v6 = vshrl.u32 %v1311_v1, %v1479_v60 }
 0x1b4   : > { %v1495_v17 = vor.u32 %v529_v5, %v528_v2  ;;  %v1497_v18 = vor.u32 %v532_v7, %v531_v4  ;;  %v536_v19 = vor.u32 %v535_v10, %v534_v8  ;;  %v539_v22 = vor.u32 %v538_v13, %v537_v11 }
 0x1b5   : > { %v542_v23 = vor.u32 %v541_v16, %v540_v14 }
 0x1b6   : > { %v551_v25 = vsel %vm543_vm6, %v1495_v17, %v1497_v18  ;;  %v555_v26 = vsel %vm543_vm6, %v1497_v18, %v536_v19  ;;  %v552_v27 = vsel %vm546_vm7, %v539_v22, 920167782  ;;  %v548_v3 = vsel %vm546_vm7, %v536_v19, 2102212464 }
 0x1b7   : > { %v556_v28 = vsel %vm546_vm7, %v542_v23, 1326507024  ;;  %v553_v29 = vsel %vm545_vm8, %v536_v19, %v552_v27  ;;  %v547_v12 = vsel %vm543_vm6, %v527_v6, %v1495_v17  ;;  %v549_v13 = vsel %vm545_vm8, %v1497_v18, %v548_v3 }
 0x1b8   : > { %v557_v30 = vsel %vm545_vm8, %v539_v22, %v556_v28  ;;  %v554_v32 = vsel %vm544_vm9, %v551_v25, %v553_v29  ;;  %v550_v60 = vsel %vm544_vm9, %v547_v12, %v549_v13 }
 0x1b9   : > { %v558_v33 = vsel %vm544_vm9, %v555_v26, %v557_v30  ;;  %v584_v40 = vand.u32 65535, %v554_v32  ;;  %v585_v42 = vshrl.u32 %v554_v32, 16  ;;  %v604_v23 = vmul.u32 %v1506_v24, %v550_v60 }
 0x1ba   : > { %v562_v37 = vand.u32 65535, %v558_v33  ;;  %v563_v38 = vshrl.u32 %v558_v33, 16  ;;  %vm654_vm9 = vweird.f32 %v1449_v41 }
 0x1bb   : > { %v587_v46 = vmul.u32 %v585_v42, %v560_v34  ;;  %v588_v47 = vmul.u32 %v584_v40, %v561_v35  ;;  %v586_v53 = vmul.u32 %v584_v40, %v560_v34  ;;  %v589_v57 = vmul.u32 %v585_v42, %v561_v35 }
 0x1bc   : > { %v565_v43 = vmul.u32 %v563_v38, %v560_v34  ;;  %v566_v44 = vmul.u32 %v562_v37, %v561_v35  ;;  %v564_v49 = vmul.u32 %v562_v37, %v560_v34  ;;  %v567_v52 = vmul.u32 %v563_v38, %v561_v35 }
 0x1bd   : > { %v590_v54 = vshll.u32 %v587_v46, 16  ;;  %v592_v61 = vshll.u32 %v588_v47, 16  ;;  %v591_v10 = vshrl.u32 %v587_v46, 16  ;;  %v593_v16 = vshrl.u32 %v588_v47, 16  ;;  %v1262_v47 = vld [vmem:[%s1591_s4] ss:$0 sm:$0xff] }
 0x1be   : > { %v568_v50 = vshll.u32 %v565_v43, 16  ;;  %v570_v55 = vshll.u32 %v566_v44, 16  ;;  %v569_v7 = vshrl.u32 %v565_v43, 16  ;;  %v571_v14 = vshrl.u32 %v566_v44, 16 }
 0x1bf   : > { %vm594_vm11 = vc.u32 %v586_v53, %v590_v54  ;;  %v596_v62 = vadd.s32 %v590_v54, %v586_v53  ;;  %v456_v53 = vadd.f32 %v1262_v47, %v1447_v39 }
 0x1c0   : > { %vm572_vm10 = vc.u32 %v564_v49, %v568_v50  ;;  %v574_v56 = vadd.s32 %v568_v50, %v564_v49  ;;  %v595_v2 = vsel %vm594_vm11, 1, %v1317_v58  ;;  %vm985_vm11 = vcmask 130048  }
 0x1c1   : > { %v573_v59 = vsel %vm572_vm10, 1, %v1317_v58  ;;  %v597_v5 = vadd.s32 %v595_v2, %v589_v57  ;;  %vm598_vm13 = vc.u32 %v596_v62, %v592_v61  ;;  %v600_v21 = vadd.s32 %v596_v62, %v592_v61 }
 0x1c2   : > { %v575_v63 = vadd.s32 %v573_v59, %v567_v52  ;;  %vm576_vm12 = vc.u32 %v574_v56, %v570_v55  ;;  %v599_v9 = vsel %vm598_vm13, 1, %v1317_v58  ;;  %v508_v59 = vmul.f32 1.442695, %v456_v53 }
 0x1c3   : > { %v577_v4 = vsel %vm576_vm12, 1, %v1317_v58  ;;  %v601_v11 = vadd.s32 %v599_v9, %v597_v5 }
 0x1c4   : > { %v579_v8 = vadd.s32 %v577_v4, %v575_v63  ;;  %1268 = vpow2.f32 %v508_v59 }
 0x1c5   : > { %v602_v19 = vadd.s32 %v601_v11, %v591_v10 }
 0x1c6   : > { %v580_v15 = vadd.s32 %v579_v8, %v569_v7 }
 0x1c7   : > { %v603_v1 = vadd.s32 %v602_v19, %v593_v16 }
 0x1c8   : > { %v581_v20 = vadd.s32 %v580_v15, %v571_v14 }
 0x1c9   : > { %v607_v22 = vadd.s32 1, %v603_v1 }
 0x1ca   : > { %vm606_vm14 = vc.u32 %v581_v20, %v600_v21  ;;  %v605_v0 = vadd.s32 %v600_v21, %v581_v20  ;;  %v1269_v11 = vpop.eup %1268 }
 0x1cb   : > { %v608_v25 = vsel %vm606_vm14, %v607_v22, %v603_v1  ;;  %v510_v19 = vmin.f32 %v1269_v11, 100.0 }
 0x1cc   : > { %v609_v17 = vadd.s32 %v608_v25, %v604_v23 }
 0x1ce   : > { %v610_v26 = vadd.s32 536870912, %v609_v17 }
 0x1d0   : > { %v611_v27 = vshrl.u32 %v610_v26, 30  ;;  %v978_v26 = vlaneseq }
 0x1d2   : > { %v612_v28 = vshll.u32 %v611_v27, 30  ;;  %v635_v49 = vsub.s32 4, %v611_v27 }
 0x1d4   : > { %v613_v18 = vsub.s32 %v609_v17, %v612_v28  ;;  %v636_v56 = vsel %vm513_vm1, %v635_v49, %v611_v27  ;;  %v979_v27 = vshrl.u32 %v978_v26, 7  ;;  %v982_v28 = vstv %s981_s28 }
 0x1d5   : > { %v638_v61 = vsel %vm512_vm2, 0, %v636_v56 }
 0x1d6   : > { %vm614_vm15 = vcmp.lt.s32.totalorder %v613_v18, 0  ;;  %v615_v29 = vsub.s32 0, %v613_v18  ;;  %v811_v4 = vadd.s32 3, %v638_v61  ;;  %v655_v8 = vand.u32 3, %v638_v61 }
 0x1d7   : > { %vm983_vm10 = vcmp.lt.s32.totalorder %v979_v27, %v982_v28 }
 0x1d8   : > { %v616_v30 = vsel %vm614_vm15, %v615_v29, %v613_v18  ;;  %v812_v9 = vand.u32 3, %v811_v4  ;;  %vm656_vm3 = vcmp.lt.s32.totalorder %v655_v8, 2  ;;  %vm657_vm4 = vcmp.eq.s32.totalorder %v655_v8, 0 }
 0x1d9   : > { %v617_v31 = vclz %v616_v30  ;;  %vm660_vm8 = vcmp.eq.s32.totalorder %v655_v8, 2 }
 0x1da   : > { %vm813_vm5 = vcmp.lt.s32.totalorder %v812_v9, 2  ;;  %vm814_vm6 = vcmp.eq.s32.totalorder %v812_v9, 0  ;;  %vm817_vm7 = vcmp.eq.s32.totalorder %v812_v9, 2 }
 0x1db   : > { %v1115_v32 = vadd.s32 4294967294, %v617_v31 }
 0x1dd   : > { %vm1116_vm0 = vcmp.lt.s32.totalorder %v1115_v32, 0 }
 0x1de   : > { %v620_v33 = vsel %vm1116_vm0, 0, %v1115_v32 }
 0x1df   : > { %v621_v34 = vsub.s32 32, %v620_v33  ;;  %v625_v35 = vsub.s32 4294967266, %v620_v33  ;;  %v622_v36 = vshll.u32 %v613_v18, %v620_v33 }
 0x1e1   : > { %v623_v37 = vshrl.u32 %v605_v0, %v621_v34  ;;  %v626_v38 = vadd.s32 127, %v625_v35 }
 0x1e3   : > { %v624_v24 = vor.u32 %v623_v37, %v622_v36  ;;  %v627_v40 = vshll.u32 %v626_v38, 23 }
 0x1e5   : > { %v628_v42 = vor.u32 4788187, %v627_v40  ;;  %v631_v44 = vcvt.s32.f32 %v624_v24 }
 0x1e7   : > { %v629_v43 = vand.u32 2147483647, %v628_v42 }
 0x1e9   : > { %v632_v45 = vmul.f32 %v631_v44, %v629_v43 }
 0x1eb   : > { %v633_v46 = vxor.u32 2147483648, %v632_v45 }
 0x1ed   : > { %v634_v48 = vsel %vm513_vm1, %v633_v46, %v632_v45 }
 0x1ee   : > { %v637_v50 = vsel %vm512_vm2, %v1449_v41, %v634_v48 }
 0x1ef   : > { %v639_v52 = vmul.f32 %v637_v50, %v637_v50 }
 0x1f1   : > { %v640_v54 = vmul.f32 -0.001358992, %v639_v52  ;;  %v647_v55 = vmul.f32 -0.00019511016, %v639_v52 }
 0x1f3   : > { %v641_v57 = vadd.f32 0.041655596, %v640_v54  ;;  %v648_v58 = vadd.f32 0.008332121, %v647_v55 }
 0x1f5   : > { %v642_v62 = vmul.f32 %v641_v57, %v639_v52  ;;  %v649_v63 = vmul.f32 %v648_v58, %v639_v52 }
 0x1f7   : > { %v643_v2 = vadd.f32 -0.4999988, %v642_v62  ;;  %v650_v3 = vadd.f32 -0.16666654, %v649_v63 }
 0x1f9   : > { %v644_v51 = vmul.f32 %v643_v2, %v639_v52  ;;  %v651_v5 = vmul.f32 %v650_v3, %v639_v52 }
 0x1fb   : > { %v645_v6 = vadd.f32 1.0, %v644_v51  ;;  %v652_v7 = vadd.f32 1.0, %v651_v5 }
 0x1fd   : > { %v653_v39 = vmul.f32 %v652_v7, %v637_v50  ;;  %v661_v10 = vxor.u32 2147483648, %v645_v6 }
 0x1ff   : > { %v658_v12 = vxor.u32 2147483648, %v653_v39  ;;  %v819_v14 = vsel %vm817_vm7, %v661_v10, %v653_v39  ;;  %v662_v16 = vsel %vm660_vm8, %v661_v10, %v653_v39 }
 0x201   : > { %v816_v13 = vsel %vm814_vm6, %v645_v6, %v658_v12  ;;  %v659_v15 = vsel %vm657_vm4, %v645_v6, %v658_v12 }
 0x202   : > { %v820_v20 = vsel %vm813_vm5, %v816_v13, %v819_v14  ;;  %v663_v21 = vsel %vm656_vm3, %v659_v15, %v662_v16 }
 0x203   : > { %v821_v60 = vsel %vm654_vm9, nan, %v820_v20  ;;  %v664_v1 = vsel %vm654_vm9, nan, %v663_v21 }
 0x204   : > { %v822_v22 = vmul.f32 %v821_v60, %v510_v19  ;;  %v665_v23 = vmul.f32 %v664_v1, %v510_v19 }
 0x206   : > { %v823_v25 = vpack.c.bf16 %v822_v22, %v822_v22  ;;  %v666_v17 = vpack.c.bf16 %v665_v23, %v665_v23 }
 0x208   : > { %912 = vmatmul.bf16.vlgmr.msra.gmra.mxu2 %v823_v25  ;;  %973 = vmatmul.bf16.vlgmr.msra.gmra.mxu3 %v666_v17 }
 0x28b   : > { %v913_v18 = vpop.f32.mrf.mxu2  ;;  %v974_v29 = vpop.f32.mrf.mxu3 }
 0x28c   : > { %v975_v41 = vadd.f32 %v974_v29, %v913_v18 }
 0x28e   : > { %v984_v30 = vsel %vm983_vm10, %v975_v41, 0.0 }
 0x28f   : > { %986 = vst.msk [vmem:[%s363_s16] sm:$0xff] %vm985_vm11, %v984_v30 }
 0x293   : > { %v915_v31 = vpop.f32.mrf.mxu2  ;;  %v976_v32 = vpop.f32.mrf.mxu3 }
 0x294 PF: > { %s19_s13 = sadd.s32 1, %s1308_s13   ;;  %s1597_s30 = smov %s1300_s11 }
 0x295   : > { %p16_p7 = scmp.ge.s32.totalorder %s19_s13, 8   ;;  %s1598_s10 = smov %s1304_s12 }
 0x296   : > { %s1599_s11 = smov %s1602_s14  ;;  %s1600_s12 = smov %s1606_s15 }
 0x297   :  { %18 = sbr.rel (!%p16_p7) target bundleno = 3 (0x3), region = 86 }

// kernel: vocos_vocoder_forward.5
= control target key start
LH: loop header
LB: loop body
LE: loop exit
PB: predicated region body
PF: predicated region fallthrough
CT: control target
= control target key end

     0   :  { %s1173_s21 = smov 0   ;;  %s1175_s22 = smov 0   ;;  %s1326_s0 = inlined_call_operand.vmem [shape: f32[2,24,64], index: 0, kind: input, shape index: {}, may-alias: {0,1,2}]   ;;  %s1327_s1 = inlined_call_operand.vmem [shape: f32[2,24,64], index: 1, kind: input, shape index: {}, may-alias: {0,1,2}]   ;;  %s1328_s2 = inlined_call_operand.vmem [shape: f32[2,24,64], index: 2, kind: input, shape index: {}, may-alias: {0,1,2}]   ;;  %s1329_s3 = inlined_call_operand.vmem [shape: f32[7,64], index: 3, kind: input, shape index: {}]   ;;  %s1330_s4 = inlined_call_operand.vmem [shape: f32[1,64], index: 4, kind: input, shape index: {}]   ;;  %s1331_s5 = inlined_call_operand.vmem [shape: f32[1,64], index: 5, kind: input, shape index: {}]   ;;  %s1332_s6 = inlined_call_operand.vmem [shape: f32[1,64], index: 6, kind: input, shape index: {}]   ;;  %s1333_s7 = inlined_call_operand.vmem [shape: bf16[64,128], index: 7, kind: input, shape index: {}]   ;;  %s1334_s8 = inlined_call_operand.vmem [shape: f32[1,128], index: 8, kind: input, shape index: {}]   ;;  %s1335_s9 = inlined_call_operand.vmem [shape: bf16[128,64], index: 9, kind: input, shape index: {}]   ;;  %s1336_s10 = inlined_call_operand.vmem [shape: f32[1,64], index: 10, kind: input, shape index: {}]   ;;  %s1337_s11 = inlined_call_operand.vmem [shape: f32[1,64], index: 11, kind: input, shape index: {}]   ;;  %s1338_s12 = inlined_call_operand.vmem [shape: f32[2,24,64], index: 12, kind: output, shape index: {}]  }
   0x1   :  { %1340 = sst [smem:[#allocation6_spill]] %s1327_s1  ;;  %s1177_s23 = smov 0  }
   0x2   :  { %s1179_s24 = smov 0   ;;  %s1181_s25 = smov 0  }
   0x3 LB: > { %1341 = sst [smem:[#allocation3_spill]] %s1099_s24  ;;  %s31_s26 = sadd.s32 1, %s1095_s23  ;;  %s1103_s25 = sphi %s1181_s25, %s22_s25   ;;  %s1099_s24 = sphi %s1179_s24, %s1349_s24   ;;  %s1095_s23 = sphi %s1177_s23, %s1351_s23   ;;  %s1091_s22 = sphi %s1175_s22, %s1347_s22   ;;  %s1087_s21 = sphi %s1173_s21, %s1350_s21  }
   0x4   : > { %s34_s27 = sadd.s32 1, %s1099_s24  ;;  %p32_p0 = scmp.ge.s32.totalorder %s31_s26, 3 }
   0x5   : > { %p927_p1 = scmp.ge.s32.totalorder %s1103_s25, 1  ;;  %p435_p2 = scmp.lt.s32.totalorder %s1103_s25, 7 }
   0x6   : > { %s1353_s26 = smov (%p32_p0, %s31_s26), 0  ;;  %s1355_s27 = smov (!%p32_p0, %s34_s27), %s1099_s24 }
   0x7   : > { %1342 = sst [smem:[#allocation4_spill]] %s1353_s26  ;;  %p436_p3 = pnand %p927_p1, %p435_p2 }
   0x8   : > { %p36_p4 = scmp.ge.s32.totalorder %s1355_s27, 2  ;;  %p508_p5 = scmp.lt.s32.totalorder (!%p436_p3), %s1091_s22, 1 }
   0x9   : > { %439 = sbr.rel (%p436_p3) target bundleno = 614 (0x266), region = 68  ;;  %p521_p6 = scmp.lt.s32.totalorder (!%p436_p3), %s1087_s21, 2 }
   0xa   : > { %s1357_s27 = smov (%p36_p4, %s1355_s27), 0  ;;  %s928_s28 = sadd.s32 (!%p436_p3), 4294967295, %s1087_s21 }
   0xb   : > { %1343 = sst [smem:[#allocation5_spill]] %s1357_s27  ;;  %s527_s29 = sadd.s32 (!%p436_p3), 1, %s1087_s21 }
   0xc   : > { %p506_p7 = scmp.gt.s32.totalorder (!%p436_p3), %s928_s28, 0  ;;  %p1209_p8 = scmp.lt.s32.totalorder (!%p436_p3), %s527_s29, 2 }
   0xd   : > { %p929_p9 = scmp.lt.s32.totalorder (!%p436_p3), %s928_s28, 2  ;;  %s1345_s1 = sld [smem:[#allocation6_spill]] (!%p436_p3) }
   0xe   : > { %s1359_s22 = smov (!%p508_p5, %s1091_s22), 1  ;;  %vm551_vm0 = vcmask 523264   ;;  %s1361_s28 = smov (!%p506_p7, %s928_s28), 0  ;;  %vm554_vm1 = vcmask 518144  }
   0xf   : > { %s522_s30 = scalar_select %p521_p6, %s1087_s21, 2 }
  0x10   : > { %s1009_s13 = smul.u32 3, %s1359_s22  ;;  %s1363_s29 = smov (!%p1209_p8, %s527_s29), 2 }
  0x11   : > { %s1365_s28 = smov (!%p929_p9, %s1361_s28), 2  ;;  %s1367_s29 = smov (!%p1209_p8, %s1363_s29), 2 }
  0x12   : > { %s524_s14 = sadd.s32 %s1009_s13, %s522_s30  ;;  %s535_s17 = sadd.s32 %s1009_s13, %s1367_s29 }
  0x13   : > { %s1213_s16 = sshll.u32 %s524_s14, 3  ;;  %s513_s14 = sadd.s32 %s1009_s13, %s1365_s28 }
  0x14   : > { %s1219_s19 = scalar_lea.vmem %s1345_s1, %s1213_s16  ;;  %s934_s27 = sshll.u32 %s513_s14, 3 }
  0x15   : > { %v550_v0 = vld [vmem:[%s1219_s19] sm:$0xff]  ;;  %s515_s26 = scalar_lea.vmem %s1326_s0, %s934_s27  ;;  %s939_s20 = sshll.u32 %s535_s17, 3 }
  0x16   : > { %552 = vst.msk [vmem:[#allocation2 + $0x3] sm:$0xff] %vm551_vm0, %v550_v0  ;;  %v553_v1 = vld [vmem:[%s515_s26 + $0x5] sm:$0x7]  ;;  %s537_s24 = scalar_lea.vmem %s1328_s2, %s939_s20  ;;  %p941_p10 = scmp.ne.s32.totalorder %s1087_s21, 0 }
  0x17   : > { %555 = vst.msk [vmem:[#allocation2] sm:$0x7] %vm554_vm1, %v553_v1  ;;  %v556_v2 = vld [vmem:[%s537_s24] sm:$0x7] }
  0x18   : > { %557 = vst.msk [vmem:[#allocation2 + $0xb] sm:$0x7] %vm554_vm1, %v556_v2  ;;  %561 = sbr.rel (%p941_p10) target bundleno = 31 (0x1f), region = 72 }
  0x1d   : > { %v1105_v3 = vmov 0.0  }
  0x1e   : > { %562 = vst.msk [vmem:[#allocation2] sm:$0x7] %vm554_vm1, %v1105_v3 }
  0x1f PF: > { %p942_p11 = scmp.ne.s32.totalorder %s1087_s21, 2 }
  0x21   : > { %566 = sbr.rel (%p942_p11) target bundleno = 40 (0x28), region = 76 }
  0x26   : > { %v1106_v4 = vmov 0.0  }
  0x27   : > { %567 = vst.msk [vmem:[#allocation2 + $0xb] sm:$0x7] %vm554_vm1, %v1106_v4 }
  0x28 PF: > { %v568_v5 = vld [vmem:[%s1329_s3] sm:$0x7f]  ;;  %v1107_v36 = vmov 64.0   ;;  %v1000_v48 = vld [vmem:[%s1333_s7 + $0x18] sm:$0xff]  ;;  %v999_v49 = vld [vmem:[%s1333_s7 + $0x10] sm:$0xff]  ;;  %s992_s13 = sshll.u32 %s1087_s21, 3  ;;  %s1346_s22 = scalar_lea.vmem %s1338_s12, %s1213_s16 }
  0x29   : > { %v570_v6 = vld [vmem:[#allocation2] sm:$0xff]  ;;  %v571_v7 = vperm.slane %v568_v5, 0  ;;  %v578_v10 = vperm.slane %v568_v5, 1  ;;  %v582_v12 = vperm.slane %v568_v5, 2  ;;  %v586_v16 = vperm.slane %v568_v5, 3  ;;  %684 = vmatpush.bf16.msra.mxu0 %v1000_v48  ;;  %v998_v50 = vld [vmem:[%s1333_s7 + $0x8] sm:$0xff] }
  0x2a   : > { %v1053_v8 = vld [vmem:[%s1330_s4] ss:$0 sm:$0xff]  ;;  %v577_v9 = vld [vmem:[#allocation2 + $0x1] sm:$0xff]  ;;  %v590_v19 = vperm.slane %v568_v5, 4  ;;  %v594_v23 = vperm.slane %v568_v5, 5  ;;  %v598_v27 = vperm.slane %v568_v5, 6  ;;  %1059 = vrcp.f32 %v1107_v36 }
  0x2b   : > { %v581_v11 = vld [vmem:[#allocation2 + $0x2] sm:$0xff]  ;;  %v572_v13 = vmul.f32 %v571_v7, %v570_v6  ;;  %v579_v14 = vmul.f32 %v578_v10, %v577_v9  ;;  %v1008_v52 = vld [vmem:[%s1335_s9 + $0x38] sm:$0xff]  ;;  %v1007_v55 = vld [vmem:[%s1335_s9 + $0x30] sm:$0xff]  ;;  %s794_s14 = ssub.s32 20, %s992_s13 }
  0x2c   : > { %v585_v15 = vld [vmem:[#allocation2 + $0x3] sm:$0xff]  ;;  %v583_v18 = vmul.f32 %v582_v12, %v581_v11  ;;  %771 = vmatpush.bf16.msra.mxu1 %v1008_v52  ;;  %v1054_v63 = vld [vmem:[%s1331_s5] ss:$0 sm:$0xff]  ;;  %v1003_v9 = vld [vmem:[%s1335_s9 + $0x10] sm:$0xff] }
  0x2d   : > { %v576_v17 = vadd.f32 %v1053_v8, %v572_v13  ;;  %v587_v22 = vmul.f32 %v586_v16, %v585_v15  ;;  %685 = vmatpush.bf16.msra.mxu0 %v999_v49  ;;  %v997_v51 = vld [vmem:[%s1333_s7] sm:$0xff]  ;;  %v1006_v6 = vld [vmem:[%s1335_s9 + $0x28] sm:$0xff]  ;;  %v1004_v8 = vld [vmem:[%s1335_s9 + $0x18] sm:$0xff] }
  0x2e   : > { %v589_v20 = vld [vmem:[#allocation2 + $0x4] sm:$0xff]  ;;  %v1055_v2 = vld [vmem:[%s1332_s6] ss:$0 sm:$0xff] }
  0x2f   : > { %v580_v21 = vadd.f32 %v579_v14, %v576_v17  ;;  %v593_v24 = vld [vmem:[#allocation2 + $0x5] sm:$0xff]  ;;  %v591_v26 = vmul.f32 %v590_v19, %v589_v20  ;;  %v1056_v12 = vld [vmem:[%s1334_s8] ss:$0 sm:$0xff] }
  0x30   : > { %v597_v28 = vld [vmem:[#allocation2 + $0x6] sm:$0xff]  ;;  %v595_v30 = vmul.f32 %v594_v23, %v593_v24  ;;  %v1060_v37 = vpop.eup %1059  ;;  %772 = vmatpush.bf16.msra.mxu1 %v1007_v55 }
  0x31   : > { %v584_v25 = vadd.f32 %v583_v18, %v580_v21  ;;  %v599_v32 = vmul.f32 %v598_v27, %v597_v28  ;;  %v607_v38 = vmul.f32 64.0, %v1060_v37  ;;  %vm611_vm2 = vweird.f32 %v1060_v37  ;;  %686 = vmatpush.bf16.msra.mxu0 %v998_v50  ;;  %v1005_v7 = vld [vmem:[%s1335_s9 + $0x20] sm:$0xff]  ;;  %v1002_v10 = vld [vmem:[%s1335_s9 + $0x8] sm:$0xff] }
  0x32   : > { %v1001_v11 = vld [vmem:[%s1335_s9] sm:$0xff] }
  0x33   : > { %v588_v29 = vadd.f32 %v587_v22, %v584_v25  ;;  %v608_v39 = vsub.f32 1.0, %v607_v38  ;;  %v1057_v27 = vld [vmem:[%s1336_s10] ss:$0 sm:$0xff] }
  0x34   : > { %773 = vmatpush.bf16.msra.mxu1 %v1006_v6  ;;  %v1058_v28 = vld [vmem:[%s1337_s11] ss:$0 sm:$0xff] }
  0x35   : > { %v592_v31 = vadd.f32 %v591_v26, %v588_v29  ;;  %v609_v40 = vmul.f32 %v1060_v37, %v608_v39  ;;  %687 = vmatpush.bf16.msra.mxu0 %v997_v51  ;;  %v791_v26 = vlaneseq }
  0x37   : > { %v596_v33 = vadd.f32 %v595_v30, %v592_v31  ;;  %v610_v41 = vadd.f32 %v1060_v37, %v609_v40  ;;  %v792_v30 = vshrl.u32 %v791_v26, 7 }
  0x38   : > { %774 = vmatpush.bf16.msra.mxu1 %v1005_v7 }
  0x39   : > { %v600_v34 = vadd.f32 %v599_v32, %v596_v33  ;;  %v612_v42 = vsel %vm611_vm2, %v1060_v37, %v610_v41  ;;  %v795_v32 = vstv %s794_s14  ;;  %v784_v33 = vld [vmem:[%s1219_s19] sm:$0xff] }
  0x3a   : > { %vm796_vm6 = vcmp.lt.s32.totalorder %v792_v30, %v795_v32 }
  0x3b   : > { %v603_v35 = vsel %vm551_vm0, %v600_v34, 0.0 }
  0x3c   : > { %604 = vadd.xlane.f32.xlu0 %v603_v35  ;;  %775 = vmatpush.bf16.msra.mxu1 %v1004_v8 }
  0x40   : > { %776 = vmatpush.bf16.msra.mxu1 %v1003_v9 }
  0x44   : > { %777 = vmatpush.bf16.msra.mxu1 %v1002_v10 }
  0x48   : > { %778 = vmatpush.bf16.msra.mxu1 %v1001_v11 }
  0xaf   : > { %v605_v43 = vpop.xlane.xlu0 %604 }
  0xb0   : > { %v613_v44 = vmul.f32 %v612_v42, %v605_v43 }
  0xb2   : > { %v614_v45 = vsub.f32 %v600_v34, %v613_v44 }
  0xb4   : > { %v615_v46 = vmul.f32 %v614_v45, %v614_v45 }
  0xb6   : > { %v616_v47 = vsel %vm551_vm0, %v615_v46, 0.0 }
  0xb7   : > { %617 = vadd.xlane.f32.xlu0 %v616_v47 }
 0x12a   : > { %v618_v53 = vpop.xlane.xlu0 %617 }
 0x12b   : > { %v619_v54 = vmul.f32 %v618_v53, %v612_v42 }
 0x12d   : > { %v620_v56 = vadd.f32 1e-06, %v619_v54 }
 0x12f   : > { %1061 = vrsqrt.f32 %v620_v56  ;;  %vm627_vm4 = vweird.f32 %v620_v56 }
 0x135   : > { %v1062_v57 = vpop.eup %1061 }
 0x136   : > { %v622_v58 = vmul.f32 %v1062_v57, %v620_v56  ;;  %vm628_vm3 = vweird.f32 %v1062_v57 }
 0x137   : > { %vm629_vm5 = vmor %vm627_vm4, %vm628_vm3 }
 0x138   : > { %v623_v59 = vmul.f32 %v1062_v57, %v622_v58 }
 0x13a   : > { %v624_v60 = vmul.f32 0.5, %v623_v59 }
 0x13c   : > { %v625_v61 = vsub.f32 1.5, %v624_v60 }
 0x13e   : > { %v626_v62 = vmul.f32 %v1062_v57, %v625_v61 }
 0x140   : > { %v630_v0 = vsel %vm629_vm5, %v1062_v57, %v626_v62 }
 0x141   : > { %v631_v1 = vmul.f32 %v630_v0, %v614_v45 }
 0x143   : > { %v635_v3 = vmul.f32 %v1054_v63, %v631_v1 }
 0x145   : > { %v639_v4 = vadd.f32 %v1055_v2, %v635_v3 }
 0x147   : > { %v640_v5 = vpack.c.bf16 %v639_v4, %v639_v4 }
 0x149   : > { %959 = vmatmul.msk.bf16.vlgmr.msra.gmra.mxu0 %vm551_vm0, %v640_v5 }
 0x1c6   : > { %v689_v13 = vpop.f32.mrf.mxu0 }
 0x1c7   : > { %v690_v14 = vadd.f32 %v1056_v12, %v689_v13 }
 0x1c9   : > { %v694_v15 = vmul.f32 %v690_v14, %v690_v14  ;;  %v693_v22 = vmul.f32 0.5, %v690_v14 }
 0x1cb   : > { %v695_v16 = vmul.f32 %v694_v15, %v690_v14 }
 0x1cd   : > { %v696_v17 = vmul.f32 0.044715, %v695_v16 }
 0x1ce   : > { %v691_v18 = vpop.f32.mrf.mxu0 }
 0x1cf   : > { %v697_v19 = vadd.f32 %v696_v17, %v690_v14 }
 0x1d1   : > { %v698_v20 = vmul.f32 0.7978846, %v697_v19 }
 0x1d3   : > { %1063 = vtanh.f32 %v698_v20 }
 0x1d9   : > { %v1064_v21 = vpop.eup %1063 }
 0x1da   : > { %v700_v23 = vadd.f32 1.0, %v1064_v21 }
 0x1dc   : > { %v701_v24 = vmul.f32 %v700_v23, %v693_v22 }
 0x1de   : > { %v702_v25 = vpack.c.bf16 %v701_v24, %v701_v24 }
 0x1e0   : > { %779 = vmatmul.bf16.vlgmr.msra.gmra.mxu1 %v702_v25 }
 0x25d   : > { %v780_v29 = vpop.f32.mrf.mxu1 }
 0x25e   : > { %v781_v31 = vadd.f32 %v1057_v27, %v780_v29 }
 0x260   : > { %v789_v34 = vmul.f32 %v1058_v28, %v781_v31 }
 0x262   : > { %v790_v35 = vadd.f32 %v789_v34, %v784_v33 }
 0x264   : > { %v797_v36 = vsel %vm796_vm6, %v790_v35, 0.0 }
 0x265   : > { %798 = vst.msk [vmem:[%s1346_s22] sm:$0xff] %vm551_vm0, %v797_v36  ;;  %v782_v37 = vpop.f32.mrf.mxu1 }
 0x266 PF: > { %s22_s25 = sadd.s32 1, %s1103_s25   ;;  %s1347_s22 = sld [smem:[#allocation3_spill]] }
 0x267   : > { %p19_p12 = scmp.ge.s32.totalorder %s22_s25, 8   ;;  %s1348_s1 = sld [smem:[#allocation4_spill]] }
 0x268   : > { %s1349_s24 = sld [smem:[#allocation5_spill]]  ;;  %s1350_s21 = smov %s1095_s23 }
 0x269   :  { %21 = sbr.rel (!%p19_p12) target bundleno = 3 (0x3), region = 112 }
 0x26d   : > { %s1351_s23 = smov %s1348_s1 }

</bundles_post_ra>
